<compile_context>
chip_gen: v5e
topology: v5e:2x2
jax: 0.10.0
libtpu: 0.0.40
codegen_flags: <defaults>
</compile_context>

<pallas_src>
import math
from functools import partial

import jax
import jax.numpy as jnp
from jax.experimental import pallas as pl
from jax.experimental.pallas import tpu as pltpu

_SUB = 8      # f32 sublane tile
_LANE = 128   # lane tile


def _round_up(x, m):
    return ((x + m - 1) // m) * m


# ----------------------------- Pallas kernels -----------------------------

def _encoder_kernel(x_ref, w_ref, b_ref, h_ref, c_ref):
    """Fused encoder recurrence, grid=(SRC_LEN,).

    x_ref : (1, B, E_pad)              embedded source token at step t (pipelined DMA)
    w_ref : (E_pad + H_pad, 4*H_pad)   stacked [W_ih ; W_hh]^T, gate order [i, f, g, o]
    b_ref : (1, 4*H_pad)               combined bias (b_ih + b_hh), zero in padding
    h_ref, c_ref : (B, H_pad)          resident output blocks == recurrent state
    """
    t = pl.program_id(0)

    @pl.when(t == 0)
    def _():
        h_ref[...] = jnp.zeros_like(h_ref)
        c_ref[...] = jnp.zeros_like(c_ref)

    H = h_ref.shape[1]
    x = x_ref[0]                                           # (B, E_pad)
    h = h_ref[...]
    xh = jnp.concatenate([x, h], axis=1)                   # (B, E_pad + H_pad)
    gates = jnp.dot(xh, w_ref[...], preferred_element_type=jnp.float32) + b_ref[...]

    i_g = jax.nn.sigmoid(gates[:, 0 * H:1 * H])
    f_g = jax.nn.sigmoid(gates[:, 1 * H:2 * H])
    g_g = jnp.tanh(gates[:, 2 * H:3 * H])
    o_g = jax.nn.sigmoid(gates[:, 3 * H:4 * H])

    c_new = f_g * c_ref[...] + i_g * g_g
    h_ref[...] = o_g * jnp.tanh(c_new)
    c_ref[...] = c_new


def _decoder_kernel(tf_ref,                     # SMEM prefetch: (TGT_LEN,) int32 teacher-force flags
                    h0_ref, c0_ref,             # (B, H_pad)  encoder final state
                    tgt_oh_ref,                 # (TGT_LEN, B, V_pad) one-hot target tokens
                    emb_ref,                    # (V_pad, E_pad) decoder embedding table (resident)
                    w_ref, b_ref,               # (E_pad+H_pad, 4*H_pad), (1, 4*H_pad)
                    fc_w_ref, fc_b_ref,         # (H_pad, V_pad), (1, V_pad)  (-1e30 in pad cols)
                    out_ref,                    # (1, B, V_pad) logits block for time t = g+1
                    h_sc, c_sc, x_oh_sc):       # VMEM scratch, persists across grid steps
    g = pl.program_id(0)
    H = h_sc.shape[1]
    B, V = x_oh_sc.shape

    @pl.when(g == 0)
    def _():
        h_sc[...] = h0_ref[...]
        c_sc[...] = c0_ref[...]
        x_oh_sc[...] = tgt_oh_ref[0]            # x = target[0]

    # embedding lookup as a one-hot matmul (gather stays in VMEM / on the MXU)
    x = jnp.dot(x_oh_sc[...], emb_ref[...], preferred_element_type=jnp.float32)  # (B, E_pad)
    h = h_sc[...]
    xh = jnp.concatenate([x, h], axis=1)
    gates = jnp.dot(xh, w_ref[...], preferred_element_type=jnp.float32) + b_ref[...]

    i_g = jax.nn.sigmoid(gates[:, 0 * H:1 * H])
    f_g = jax.nn.sigmoid(gates[:, 1 * H:2 * H])
    g_g = jnp.tanh(gates[:, 2 * H:3 * H])
    o_g = jax.nn.sigmoid(gates[:, 3 * H:4 * H])

    c_new = f_g * c_sc[...] + i_g * g_g
    h_new = o_g * jnp.tanh(c_new)
    c_sc[...] = c_new
    h_sc[...] = h_new

    # output projection; padded vocab columns carry -1e30 bias so argmax ignores them
    logits = jnp.dot(h_new, fc_w_ref[...], preferred_element_type=jnp.float32) + fc_b_ref[...]
    out_ref[0] = logits

    # next input token: teacher forcing vs greedy argmax, entirely on-chip.
    lane = jax.lax.broadcasted_iota(jnp.int32, (B, V), 1).astype(jnp.float32)
    row_max = jnp.max(logits, axis=1, keepdims=True)
    best_idx = jnp.min(jnp.where(logits == row_max, lane, float(V)),
                       axis=1, keepdims=True)                    # first-occurrence argmax
    best_oh = (lane == best_idx).astype(jnp.float32)
    tf = (tf_ref[g + 1] > 0).astype(jnp.float32)                 # scalar from SMEM
    x_oh_sc[...] = tf * tgt_oh_ref[g + 1] + (1.0 - tf) * best_oh


# ----------------------------- pallas_call wrappers -----------------------------

def run_encoder(src_emb, enc_w, enc_b):
    """src_emb: (SRC_LEN, B_pad, E_pad) f32 -> final (h, c), each (B_pad, H_pad)."""
    src_len, b_pad, e_pad = src_emb.shape
    h_pad = enc_w.shape[1] // 4

    return pl.pallas_call(
        _encoder_kernel,
        out_shape=(jax.ShapeDtypeStruct((b_pad, h_pad), jnp.float32),
                   jax.ShapeDtypeStruct((b_pad, h_pad), jnp.float32)),
        grid_spec=pltpu.PrefetchScalarGridSpec(
            num_scalar_prefetch=0,
            grid=(src_len,),
            in_specs=[
                pl.BlockSpec((1, b_pad, e_pad), lambda t: (t, 0, 0)),   # pipelined x
                pl.BlockSpec(enc_w.shape, lambda t: (0, 0)),            # resident weights
                pl.BlockSpec(enc_b.shape, lambda t: (0, 0)),
            ],
            out_specs=(
                pl.BlockSpec((b_pad, h_pad), lambda t: (0, 0)),         # resident h
                pl.BlockSpec((b_pad, h_pad), lambda t: (0, 0)),         # resident c
            ),
        ),
        compiler_params=pltpu.CompilerParams(dimension_semantics=("arbitrary",)),
    )(src_emb, enc_w, enc_b)


def run_decoder(tf_flags, h0, c0, tgt_oh, dec_emb, dec_w, dec_b, fc_w, fc_b):
    """Returns logits for timesteps 1..TGT_LEN-1: (TGT_LEN-1, B_pad, V_pad)."""
    tgt_len, b_pad, v_pad = tgt_oh.shape
    h_pad = h0.shape[1]
    steps = tgt_len - 1

    return pl.pallas_call(
        _decoder_kernel,
        out_shape=jax.ShapeDtypeStruct((steps, b_pad, v_pad), jnp.float32),
        grid_spec=pltpu.PrefetchScalarGridSpec(
            num_scalar_prefetch=1,                                      # tf_flags -> SMEM
            grid=(steps,),
            in_specs=[
                pl.BlockSpec(h0.shape, lambda g, tf: (0, 0)),
                pl.BlockSpec(c0.shape, lambda g, tf: (0, 0)),
                pl.BlockSpec(tgt_oh.shape, lambda g, tf: (0, 0, 0)),
                pl.BlockSpec(dec_emb.shape, lambda g, tf: (0, 0)),
                pl.BlockSpec(dec_w.shape, lambda g, tf: (0, 0)),
                pl.BlockSpec(dec_b.shape, lambda g, tf: (0, 0)),
                pl.BlockSpec(fc_w.shape, lambda g, tf: (0, 0)),
                pl.BlockSpec(fc_b.shape, lambda g, tf: (0, 0)),
            ],
            out_specs=pl.BlockSpec((1, b_pad, v_pad), lambda g, tf: (g, 0, 0)),
            scratch_shapes=[
                pltpu.VMEM((b_pad, h_pad), jnp.float32),   # h
                pltpu.VMEM((b_pad, h_pad), jnp.float32),   # c
                pltpu.VMEM((b_pad, v_pad), jnp.float32),   # current input token, one-hot
            ],
        ),
        compiler_params=pltpu.CompilerParams(dimension_semantics=("arbitrary",)),
    )(tf_flags, h0, c0, tgt_oh, dec_emb, dec_w, dec_b, fc_w, fc_b)


# ----------------------------- params (PyTorch layout) & packing -----------------------------

def init_params(key, src_vocab, tgt_vocab, emb_dim, hid_dim):
    """Natural-shape parameters using PyTorch layouts (nn.Embedding / nn.LSTM / nn.Linear)."""
    ks = jax.random.split(key, 12)
    kh = 1.0 / math.sqrt(hid_dim)

    def u(k, shape, bound):
        return jax.random.uniform(k, shape, jnp.float32, -bound, bound)

    return {
        "enc_emb": u(ks[0], (src_vocab, emb_dim), 1.0),
        "enc_w_ih": u(ks[1], (4 * hid_dim, emb_dim), kh),    # gate order [i, f, g, o]
        "enc_w_hh": u(ks[2], (4 * hid_dim, hid_dim), kh),
        "enc_b_ih": u(ks[3], (4 * hid_dim,), kh),
        "enc_b_hh": u(ks[4], (4 * hid_dim,), kh),
        "dec_emb": u(ks[5], (tgt_vocab, emb_dim), 1.0),
        "dec_w_ih": u(ks[6], (4 * hid_dim, emb_dim), kh),
        "dec_w_hh": u(ks[7], (4 * hid_dim, hid_dim), kh),
        "dec_b_ih": u(ks[8], (4 * hid_dim,), kh),
        "dec_b_hh": u(ks[9], (4 * hid_dim,), kh),
        "fc_w": u(ks[10], (tgt_vocab, hid_dim), kh),
        "fc_b": u(ks[11], (tgt_vocab,), kh),
    }


def _pack_lstm(w_ih, w_hh, b_ih, b_hh, emb_dim, hid_dim, e_pad, h_pad):
    """Stack [W_ih ; W_hh]^T into one (E_pad+H_pad, 4*H_pad) slab; each gate owns a full
    H_pad-wide lane block.  Zero padding keeps padded hidden lanes exactly 0."""
    w = jnp.zeros((e_pad + h_pad, 4 * h_pad), jnp.float32)
    b = jnp.zeros((1, 4 * h_pad), jnp.float32)
    for gt in range(4):
        wi = w_ih[gt * hid_dim:(gt + 1) * hid_dim, :]       # (H, E)
        wh = w_hh[gt * hid_dim:(gt + 1) * hid_dim, :]       # (H, H)
        bg = b_ih[gt * hid_dim:(gt + 1) * hid_dim] + b_hh[gt * hid_dim:(gt + 1) * hid_dim]
        w = w.at[:emb_dim, gt * h_pad:gt * h_pad + hid_dim].set(wi.T)
        w = w.at[e_pad:e_pad + hid_dim, gt * h_pad:gt * h_pad + hid_dim].set(wh.T)
        b = b.at[0, gt * h_pad:gt * h_pad + hid_dim].set(bg)
    return w, b


def pack_params(p, src_vocab, tgt_vocab, emb_dim, hid_dim):
    e_pad = _round_up(emb_dim, _LANE)
    h_pad = _round_up(hid_dim, _LANE)
    v_pad = _round_up(tgt_vocab, _LANE)

    enc_w, enc_b = _pack_lstm(p["enc_w_ih"], p["enc_w_hh"], p["enc_b_ih"], p["enc_b_hh"],
                              emb_dim, hid_dim, e_pad, h_pad)
    dec_w, dec_b = _pack_lstm(p["dec_w_ih"], p["dec_w_hh"], p["dec_b_ih"], p["dec_b_hh"],
                              emb_dim, hid_dim, e_pad, h_pad)

    enc_emb = jnp.zeros((src_vocab, e_pad), jnp.float32).at[:, :emb_dim].set(p["enc_emb"])
    dec_emb = jnp.zeros((v_pad, e_pad), jnp.float32).at[:tgt_vocab, :emb_dim].set(p["dec_emb"])

    fc_w = jnp.zeros((h_pad, v_pad), jnp.float32).at[:hid_dim, :tgt_vocab].set(p["fc_w"].T)
    # -1e30 in padded vocab columns so the in-kernel argmax never selects a padding token
    fc_b = jnp.full((1, v_pad), -1e30, jnp.float32).at[0, :tgt_vocab].set(p["fc_b"])

    return {"enc_emb": enc_emb, "enc_w": enc_w, "enc_b": enc_b,
            "dec_emb": dec_emb, "dec_w": dec_w, "dec_b": dec_b,
            "fc_w": fc_w, "fc_b": fc_b}


# ----------------------------- forward (jit) -----------------------------

@partial(jax.jit, static_argnames=("tgt_vocab",))
def seq2seq_forward(packed, source, target, tf_draws, teacher_force_ratio, *, tgt_vocab):
    """Mirrors Seq2Seq.forward: returns outputs (TGT_LEN, B, tgt_vocab), outputs[0] == 0."""
    src_len, batch = source.shape
    tgt_len, _ = target.shape
    b_pad = _round_up(max(batch, _SUB), _SUB)
    v_pad = packed["fc_b"].shape[1]

    # bulk embedding gather for the whole source sequence, padded to the sublane tile
    src_emb = packed["enc_emb"][source]                                # (S, B, E_pad)
    src_emb = jnp.pad(src_emb, ((0, 0), (0, b_pad - batch), (0, 0)))

    h0, c0 = run_encoder(src_emb, packed["enc_w"], packed["enc_b"])

    tgt_pad = jnp.pad(target, ((0, 0), (0, b_pad - batch)))
    tgt_oh = jax.nn.one_hot(tgt_pad, v_pad, dtype=jnp.float32)         # (T, B_pad, V_pad)
    # deterministic stand-in for python random.random() per decoding step
    tf_flags = (tf_draws < teacher_force_ratio).astype(jnp.int32)      # (T,)

    logits = run_decoder(tf_flags, h0, c0, tgt_oh,
                         packed["dec_emb"], packed["dec_w"], packed["dec_b"],
                         packed["fc_w"], packed["fc_b"])               # (T-1, B_pad, V_pad)

    outputs = jnp.concatenate(
        [jnp.zeros((1, b_pad, v_pad), jnp.float32), logits], axis=0)
    return outputs[:, :batch, :tgt_vocab]


# ----------------------------- pure-JAX reference (for validation) -----------------------------

def reference_forward(p, source, target, tf_draws, teacher_force_ratio, tgt_vocab, hid_dim):
    dot = partial(jnp.dot, precision=jax.lax.Precision.HIGHEST)

    def cell(x, h, c, w_ih, w_hh, b_ih, b_hh):
        gates = dot(x, w_ih.T) + dot(h, w_hh.T) + b_ih + b_hh
        i, f, g, o = jnp.split(gates, 4, axis=1)
        c = jax.nn.sigmoid(f) * c + jax.nn.sigmoid(i) * jnp.tanh(g)
        h = jax.nn.sigmoid(o) * jnp.tanh(c)
        return h, c

    src_len, batch = source.shape
    tgt_len, _ = target.shape
    h = jnp.zeros((batch, hid_dim), jnp.float32)
    c = jnp.zeros((batch, hid_dim), jnp.float32)
    for t in range(src_len):
        h, c = cell(p["enc_emb"][source[t]], h, c,
                    p["enc_w_ih"], p["enc_w_hh"], p["enc_b_ih"], p["enc_b_hh"])

    outputs = [jnp.zeros((batch, tgt_vocab), jnp.float32)]
    x_tok = target[0]
    for t in range(1, tgt_len):
        h, c = cell(p["dec_emb"][x_tok], h, c,
                    p["dec_w_ih"], p["dec_w_hh"], p["dec_b_ih"], p["dec_b_hh"])
        logits = dot(h, p["fc_w"].T) + p["fc_b"]
        outputs.append(logits)
        best = jnp.argmax(logits, axis=1).astype(target.dtype)
        x_tok = jnp.where(tf_draws[t] < teacher_force_ratio, target[t], best)
    return jnp.stack(outputs, axis=0)


# ----------------------------- main -----------------------------

if __name__ == "__main__":
    SRC_VOCAB, TGT_VOCAB = 24, 32
    EMB_DIM, HID_DIM = 16, 32
    BATCH, SRC_LEN, TGT_LEN = 4, 6, 8

    key = jax.random.PRNGKey(0)
    k_params, k_src, k_tgt, k_tf = jax.random.split(key, 4)

    params = init_params(k_params, SRC_VOCAB, TGT_VOCAB, EMB_DIM, HID_DIM)
    packed = pack_params(params, SRC_VOCAB, TGT_VOCAB, EMB_DIM, HID_DIM)

    source = jax.random.randint(k_src, (SRC_LEN, BATCH), 0, SRC_VOCAB, jnp.int32)
    target = jax.random.randint(k_tgt, (TGT_LEN, BATCH), 0, TGT_VOCAB, jnp.int32)
    tf_draws = jax.random.uniform(k_tf, (TGT_LEN,), jnp.float32)

    outputs = seq2seq_forward(packed, source, target, tf_draws, 0.5, tgt_vocab=TGT_VOCAB)
    outputs = jax.block_until_ready(outputs)

    assert outputs.shape == (TGT_LEN, BATCH, TGT_VOCAB)
    assert bool(jnp.all(outputs[0] == 0.0))

    # Numerics check against a pure-JAX reference with teacher forcing always on
    # (removes argmax tie-break sensitivity from the comparison path).
    out_tf = seq2seq_forward(packed, source, target, tf_draws, 1.0, tgt_vocab=TGT_VOCAB)
    ref_tf = reference_forward(params, source, target, tf_draws, 1.0, TGT_VOCAB, HID_DIM)
    err = float(jnp.max(jnp.abs(out_tf - ref_tf)))
    assert err < 2e-2, f"kernel vs reference mismatch: {err}"

    print("KERNEL_OK")
</pallas_src>

<mosaic_0001>
module attributes {stable_mosaic.version = 11 : i64} {
  func.func @_encoder_kernel(%arg0: i32, %arg1: memref<1x8x128xf32, #tpu.memory_space<vmem>>, %arg2: memref<256x512xf32, #tpu.memory_space<vmem>>, %arg3: memref<1x512xf32, #tpu.memory_space<vmem>>, %arg4: memref<8x128xf32, #tpu.memory_space<vmem>>, %arg5: memref<8x128xf32, #tpu.memory_space<vmem>>) attributes {dimension_semantics = [#tpu.dimension_semantics<arbitrary>], iteration_bounds = array<i64: 6>, scalar_prefetch = 0 : i64, scratch_operands = 0 : i64, tpu.core_type = #tpu.core_type<tc>, window_params = [{transform_indices = @transform_0, window_bounds = array<i64: 1, 8, 128>}, {pipeline_mode = #tpu.pipeline_mode<synchronous>, transform_indices = @transform_1, window_bounds = array<i64: 256, 512>}, {pipeline_mode = #tpu.pipeline_mode<synchronous>, transform_indices = @transform_2, window_bounds = array<i64: 1, 512>}, {pipeline_mode = #tpu.pipeline_mode<synchronous>, transform_indices = @transform_3, window_bounds = array<i64: 8, 128>}, {pipeline_mode = #tpu.pipeline_mode<synchronous>, transform_indices = @transform_4, window_bounds = array<i64: 8, 128>}]} {
    %c0_i32 = arith.constant 0 : i32
    %0 = arith.cmpi eq, %arg0, %c0_i32 : i32
    %1 = arith.extui %0 : i1 to i32
    %c0_i32_0 = arith.constant 0 : i32
    %2 = arith.cmpi ne, %1, %c0_i32_0 : i32
    scf.if %2 {
      %cst_18 = arith.constant 0.000000e+00 : f32
      %40 = vector.broadcast %cst_18 : f32 to vector<8x128xf32>
      %c0_19 = arith.constant 0 : index
      %c0_20 = arith.constant 0 : index
      %41 = vector.load %arg4[%c0_19, %c0_20] : memref<8x128xf32, #tpu.memory_space<vmem>>, vector<8x128xf32>
      tpu.vector_store %arg4[%c0_19, %c0_20], %40 {strides = array<i32>} : memref<8x128xf32, #tpu.memory_space<vmem>>, vector<8x128xf32>,
      %cst_21 = arith.constant 0.000000e+00 : f32
      %42 = vector.broadcast %cst_21 : f32 to vector<8x128xf32>
      %c0_22 = arith.constant 0 : index
      %c0_23 = arith.constant 0 : index
      %43 = vector.load %arg5[%c0_22, %c0_23] : memref<8x128xf32, #tpu.memory_space<vmem>>, vector<8x128xf32>
      tpu.vector_store %arg5[%c0_22, %c0_23], %42 {strides = array<i32>} : memref<8x128xf32, #tpu.memory_space<vmem>>, vector<8x128xf32>,
    } else {
    }
    %c0 = arith.constant 0 : index
    %c0_1 = arith.constant 0 : index
    %c0_2 = arith.constant 0 : index
    %3 = vector.load %arg1[%c0, %c0_1, %c0_2] : memref<1x8x128xf32, #tpu.memory_space<vmem>>, vector<1x8x128xf32>
    %4 = vector.shape_cast %3 : vector<1x8x128xf32> to vector<8x128xf32>
    %c0_3 = arith.constant 0 : index
    %c0_4 = arith.constant 0 : index
    %5 = vector.load %arg4[%c0_3, %c0_4] : memref<8x128xf32, #tpu.memory_space<vmem>>, vector<8x128xf32>
    %6 = tpu.concatenate %4, %5 in 1 : vector<8x128xf32>, vector<8x128xf32> -> vector<8x256xf32>
    %c0_5 = arith.constant 0 : index
    %c0_6 = arith.constant 0 : index
    %7 = vector.load %arg2[%c0_5, %c0_6] : memref<256x512xf32, #tpu.memory_space<vmem>>, vector<256x512xf32>
    %cst = arith.constant dense<0.000000e+00> : vector<8x512xf32>
    %8 = tpu.matmul %6, %7, %cst {dimension_numbers = #tpu.dot_dimension_numbers<[1], [0], [0], [1], [0, 0, 1, 1], [], []>} : vector<8x256xf32>, vector<256x512xf32>, vector<8x512xf32> -> vector<8x512xf32>
    %c0_7 = arith.constant 0 : index
    %c0_8 = arith.constant 0 : index
    %9 = vector.load %arg3[%c0_7, %c0_8] : memref<1x512xf32, #tpu.memory_space<vmem>>, vector<1x512xf32>
    %10 = vector.broadcast %9 : vector<1x512xf32> to vector<8x512xf32>
    %11 = arith.addf %8, %10 : vector<8x512xf32>
    %12 = vector.extract_strided_slice %11 {offsets = [0, 0], sizes = [8, 128], strides = [1, 1]} : vector<8x512xf32> to vector<8x128xf32>
    %13 = arith.negf %12 : vector<8x128xf32>
    %14 = math.exp %13 : vector<8x128xf32>
    %cst_9 = arith.constant 1.000000e+00 : f32
    %15 = vector.broadcast %cst_9 : f32 to vector<8x128xf32>
    %16 = arith.addf %15, %14 : vector<8x128xf32>
    %17 = arith.divf %15, %16 : vector<8x128xf32>
    %18 = vector.extract_strided_slice %11 {offsets = [0, 128], sizes = [8, 128], strides = [1, 1]} : vector<8x512xf32> to vector<8x128xf32>
    %19 = arith.negf %18 : vector<8x128xf32>
    %20 = math.exp %19 : vector<8x128xf32>
    %cst_10 = arith.constant 1.000000e+00 : f32
    %21 = vector.broadcast %cst_10 : f32 to vector<8x128xf32>
    %22 = arith.addf %21, %20 : vector<8x128xf32>
    %23 = arith.divf %21, %22 : vector<8x128xf32>
    %24 = vector.extract_strided_slice %11 {offsets = [0, 256], sizes = [8, 128], strides = [1, 1]} : vector<8x512xf32> to vector<8x128xf32>
    %25 = math.tanh %24 : vector<8x128xf32>
    %26 = vector.extract_strided_slice %11 {offsets = [0, 384], sizes = [8, 128], strides = [1, 1]} : vector<8x512xf32> to vector<8x128xf32>
    %27 = arith.negf %26 : vector<8x128xf32>
    %28 = math.exp %27 : vector<8x128xf32>
    %cst_11 = arith.constant 1.000000e+00 : f32
    %29 = vector.broadcast %cst_11 : f32 to vector<8x128xf32>
    %30 = arith.addf %29, %28 : vector<8x128xf32>
    %31 = arith.divf %29, %30 : vector<8x128xf32>
    %c0_12 = arith.constant 0 : index
    %c0_13 = arith.constant 0 : index
    %32 = vector.load %arg5[%c0_12, %c0_13] : memref<8x128xf32, #tpu.memory_space<vmem>>, vector<8x128xf32>
    %33 = arith.mulf %23, %32 : vector<8x128xf32>
    %34 = arith.mulf %17, %25 : vector<8x128xf32>
    %35 = arith.addf %33, %34 : vector<8x128xf32>
    %36 = math.tanh %35 : vector<8x128xf32>
    %37 = arith.mulf %31, %36 : vector<8x128xf32>
    %c0_14 = arith.constant 0 : index
    %c0_15 = arith.constant 0 : index
    %38 = vector.load %arg4[%c0_14, %c0_15] : memref<8x128xf32, #tpu.memory_space<vmem>>, vector<8x128xf32>
    tpu.vector_store %arg4[%c0_14, %c0_15], %37 {strides = array<i32>} : memref<8x128xf32, #tpu.memory_space<vmem>>, vector<8x128xf32>,
    %c0_16 = arith.constant 0 : index
    %c0_17 = arith.constant 0 : index
    %39 = vector.load %arg5[%c0_16, %c0_17] : memref<8x128xf32, #tpu.memory_space<vmem>>, vector<8x128xf32>
    tpu.vector_store %arg5[%c0_16, %c0_17], %35 {strides = array<i32>} : memref<8x128xf32, #tpu.memory_space<vmem>>, vector<8x128xf32>,
    return
  }
  func.func @transform_0(%arg0: i32) -> (i32, i32, i32) {
    %c0_i32 = arith.constant 0 : i32
    %c0_i32_0 = arith.constant 0 : i32
    %c0_i32_1 = arith.constant 0 : i32
    return %arg0, %c0_i32, %c0_i32_0 : i32, i32, i32
  }
  func.func @transform_1(%arg0: i32) -> (i32, i32) {
    %c0_i32 = arith.constant 0 : i32
    %c0_i32_0 = arith.constant 0 : i32
    %c0_i32_1 = arith.constant 0 : i32
    return %c0_i32, %c0_i32_0 : i32, i32
  }
  func.func @transform_2(%arg0: i32) -> (i32, i32) {
    %c0_i32 = arith.constant 0 : i32
    %c0_i32_0 = arith.constant 0 : i32
    %c0_i32_1 = arith.constant 0 : i32
    return %c0_i32, %c0_i32_0 : i32, i32
  }
  func.func @transform_3(%arg0: i32) -> (i32, i32) {
    %c0_i32 = arith.constant 0 : i32
    %c0_i32_0 = arith.constant 0 : i32
    %c0_i32_1 = arith.constant 0 : i32
    return %c0_i32, %c0_i32_0 : i32, i32
  }
  func.func @transform_4(%arg0: i32) -> (i32, i32) {
    %c0_i32 = arith.constant 0 : i32
    %c0_i32_0 = arith.constant 0 : i32
    %c0_i32_1 = arith.constant 0 : i32
    return %c0_i32, %c0_i32_0 : i32, i32
  }
}

module attributes {stable_mosaic.version = 11 : i64} {
  func.func @_decoder_kernel(%arg0: i32, %arg1: memref<8xi32, #tpu.memory_space<smem>>, %arg2: memref<8x128xf32, #tpu.memory_space<vmem>>, %arg3: memref<8x128xf32, #tpu.memory_space<vmem>>, %arg4: memref<8x8x128xf32, #tpu.memory_space<vmem>>, %arg5: memref<128x128xf32, #tpu.memory_space<vmem>>, %arg6: memref<256x512xf32, #tpu.memory_space<vmem>>, %arg7: memref<1x512xf32, #tpu.memory_space<vmem>>, %arg8: memref<128x128xf32, #tpu.memory_space<vmem>>, %arg9: memref<1x128xf32, #tpu.memory_space<vmem>>, %arg10: memref<1x8x128xf32, #tpu.memory_space<vmem>>, %arg11: memref<8x128xf32, #tpu.memory_space<vmem>>, %arg12: memref<8x128xf32, #tpu.memory_space<vmem>>, %arg13: memref<8x128xf32, #tpu.memory_space<vmem>>) attributes {dimension_semantics = [#tpu.dimension_semantics<arbitrary>], iteration_bounds = array<i64: 7>, scalar_prefetch = 1 : i64, scratch_operands = 3 : i64, tpu.core_type = #tpu.core_type<tc>, window_params = [{pipeline_mode = #tpu.pipeline_mode<synchronous>, transform_indices = @transform_0, window_bounds = array<i64: 8, 128>}, {pipeline_mode = #tpu.pipeline_mode<synchronous>, transform_indices = @transform_1, window_bounds = array<i64: 8, 128>}, {pipeline_mode = #tpu.pipeline_mode<synchronous>, transform_indices = @transform_2, window_bounds = array<i64: 8, 8, 128>}, {pipeline_mode = #tpu.pipeline_mode<synchronous>, transform_indices = @transform_3, window_bounds = array<i64: 128, 128>}, {pipeline_mode = #tpu.pipeline_mode<synchronous>, transform_indices = @transform_4, window_bounds = array<i64: 256, 512>}, {pipeline_mode = #tpu.pipeline_mode<synchronous>, transform_indices = @transform_5, window_bounds = array<i64: 1, 512>}, {pipeline_mode = #tpu.pipeline_mode<synchronous>, transform_indices = @transform_6, window_bounds = array<i64: 128, 128>}, {pipeline_mode = #tpu.pipeline_mode<synchronous>, transform_indices = @transform_7, window_bounds = array<i64: 1, 128>}, {transform_indices = @transform_8, window_bounds = array<i64: 1, 8, 128>}]} {
    %c0_i32 = arith.constant 0 : i32
    %0 = arith.cmpi eq, %arg0, %c0_i32 : i32
    %1 = arith.extui %0 : i1 to i32
    %c0_i32_0 = arith.constant 0 : i32
    %2 = arith.cmpi ne, %1, %c0_i32_0 : i32
    scf.if %2 {
      %c0_38 = arith.constant 0 : index
      %c0_39 = arith.constant 0 : index
      %80 = vector.load %arg2[%c0_38, %c0_39] : memref<8x128xf32, #tpu.memory_space<vmem>>, vector<8x128xf32>
      %c0_40 = arith.constant 0 : index
      %c0_41 = arith.constant 0 : index
      %81 = vector.load %arg11[%c0_40, %c0_41] : memref<8x128xf32, #tpu.memory_space<vmem>>, vector<8x128xf32>
      tpu.vector_store %arg11[%c0_40, %c0_41], %80 {strides = array<i32>} : memref<8x128xf32, #tpu.memory_space<vmem>>, vector<8x128xf32>,
      %c0_42 = arith.constant 0 : index
      %c0_43 = arith.constant 0 : index
      %82 = vector.load %arg3[%c0_42, %c0_43] : memref<8x128xf32, #tpu.memory_space<vmem>>, vector<8x128xf32>
      %c0_44 = arith.constant 0 : index
      %c0_45 = arith.constant 0 : index
      %83 = vector.load %arg12[%c0_44, %c0_45] : memref<8x128xf32, #tpu.memory_space<vmem>>, vector<8x128xf32>
      tpu.vector_store %arg12[%c0_44, %c0_45], %82 {strides = array<i32>} : memref<8x128xf32, #tpu.memory_space<vmem>>, vector<8x128xf32>,
      %c0_46 = arith.constant 0 : index
      %c0_47 = arith.constant 0 : index
      %c0_48 = arith.constant 0 : index
      %84 = vector.load %arg4[%c0_46, %c0_47, %c0_48] : memref<8x8x128xf32, #tpu.memory_space<vmem>>, vector<1x8x128xf32>
      %85 = vector.shape_cast %84 : vector<1x8x128xf32> to vector<8x128xf32>
      %c0_49 = arith.constant 0 : index
      %c0_50 = arith.constant 0 : index
      %86 = vector.load %arg13[%c0_49, %c0_50] : memref<8x128xf32, #tpu.memory_space<vmem>>, vector<8x128xf32>
      tpu.vector_store %arg13[%c0_49, %c0_50], %85 {strides = array<i32>} : memref<8x128xf32, #tpu.memory_space<vmem>>, vector<8x128xf32>,
    } else {
    }
    %c0 = arith.constant 0 : index
    %c0_1 = arith.constant 0 : index
    %3 = vector.load %arg13[%c0, %c0_1] : memref<8x128xf32, #tpu.memory_space<vmem>>, vector<8x128xf32>
    %c0_2 = arith.constant 0 : index
    %c0_3 = arith.constant 0 : index
    %4 = vector.load %arg5[%c0_2, %c0_3] : memref<128x128xf32, #tpu.memory_space<vmem>>, vector<128x128xf32>
    %cst = arith.constant dense<0.000000e+00> : vector<8x128xf32>
    %5 = tpu.matmul %3, %4, %cst {dimension_numbers = #tpu.dot_dimension_numbers<[1], [0], [0], [1], [0, 0, 1, 1], [], []>} : vector<8x128xf32>, vector<128x128xf32>, vector<8x128xf32> -> vector<8x128xf32>
    %c0_4 = arith.constant 0 : index
    %c0_5 = arith.constant 0 : index
    %6 = vector.load %arg11[%c0_4, %c0_5] : memref<8x128xf32, #tpu.memory_space<vmem>>, vector<8x128xf32>
    %7 = tpu.concatenate %5, %6 in 1 : vector<8x128xf32>, vector<8x128xf32> -> vector<8x256xf32>
    %c0_6 = arith.constant 0 : index
    %c0_7 = arith.constant 0 : index
    %8 = vector.load %arg6[%c0_6, %c0_7] : memref<256x512xf32, #tpu.memory_space<vmem>>, vector<256x512xf32>
    %cst_8 = arith.constant dense<0.000000e+00> : vector<8x512xf32>
    %9 = tpu.matmul %7, %8, %cst_8 {dimension_numbers = #tpu.dot_dimension_numbers<[1], [0], [0], [1], [0, 0, 1, 1], [], []>} : vector<8x256xf32>, vector<256x512xf32>, vector<8x512xf32> -> vector<8x512xf32>
    %c0_9 = arith.constant 0 : index
    %c0_10 = arith.constant 0 : index
    %10 = vector.load %arg7[%c0_9, %c0_10] : memref<1x512xf32, #tpu.memory_space<vmem>>, vector<1x512xf32>
    %11 = vector.broadcast %10 : vector<1x512xf32> to vector<8x512xf32>
    %12 = arith.addf %9, %11 : vector<8x512xf32>
    %13 = vector.extract_strided_slice %12 {offsets = [0, 0], sizes = [8, 128], strides = [1, 1]} : vector<8x512xf32> to vector<8x128xf32>
    %14 = arith.negf %13 : vector<8x128xf32>
    %15 = math.exp %14 : vector<8x128xf32>
    %cst_11 = arith.constant 1.000000e+00 : f32
    %16 = vector.broadcast %cst_11 : f32 to vector<8x128xf32>
    %17 = arith.addf %16, %15 : vector<8x128xf32>
    %18 = arith.divf %16, %17 : vector<8x128xf32>
    %19 = vector.extract_strided_slice %12 {offsets = [0, 128], sizes = [8, 128], strides = [1, 1]} : vector<8x512xf32> to vector<8x128xf32>
    %20 = arith.negf %19 : vector<8x128xf32>
    %21 = math.exp %20 : vector<8x128xf32>
    %cst_12 = arith.constant 1.000000e+00 : f32
    %22 = vector.broadcast %cst_12 : f32 to vector<8x128xf32>
    %23 = arith.addf %22, %21 : vector<8x128xf32>
    %24 = arith.divf %22, %23 : vector<8x128xf32>
    %25 = vector.extract_strided_slice %12 {offsets = [0, 256], sizes = [8, 128], strides = [1, 1]} : vector<8x512xf32> to vector<8x128xf32>
    %26 = math.tanh %25 : vector<8x128xf32>
    %27 = vector.extract_strided_slice %12 {offsets = [0, 384], sizes = [8, 128], strides = [1, 1]} : vector<8x512xf32> to vector<8x128xf32>
    %28 = arith.negf %27 : vector<8x128xf32>
    %29 = math.exp %28 : vector<8x128xf32>
    %cst_13 = arith.constant 1.000000e+00 : f32
    %30 = vector.broadcast %cst_13 : f32 to vector<8x128xf32>
    %31 = arith.addf %30, %29 : vector<8x128xf32>
    %32 = arith.divf %30, %31 : vector<8x128xf32>
    %c0_14 = arith.constant 0 : index
    %c0_15 = arith.constant 0 : index
    %33 = vector.load %arg12[%c0_14, %c0_15] : memref<8x128xf32, #tpu.memory_space<vmem>>, vector<8x128xf32>
    %34 = arith.mulf %24, %33 : vector<8x128xf32>
    %35 = arith.mulf %18, %26 : vector<8x128xf32>
    %36 = arith.addf %34, %35 : vector<8x128xf32>
    %37 = math.tanh %36 : vector<8x128xf32>
    %38 = arith.mulf %32, %37 : vector<8x128xf32>
    %c0_16 = arith.constant 0 : index
    %c0_17 = arith.constant 0 : index
    %39 = vector.load %arg12[%c0_16, %c0_17] : memref<8x128xf32, #tpu.memory_space<vmem>>, vector<8x128xf32>
    tpu.vector_store %arg12[%c0_16, %c0_17], %36 {strides = array<i32>} : memref<8x128xf32, #tpu.memory_space<vmem>>, vector<8x128xf32>,
    %c0_18 = arith.constant 0 : index
    %c0_19 = arith.constant 0 : index
    %40 = vector.load %arg11[%c0_18, %c0_19] : memref<8x128xf32, #tpu.memory_space<vmem>>, vector<8x128xf32>
    tpu.vector_store %arg11[%c0_18, %c0_19], %38 {strides = array<i32>} : memref<8x128xf32, #tpu.memory_space<vmem>>, vector<8x128xf32>,
    %c0_20 = arith.constant 0 : index
    %c0_21 = arith.constant 0 : index
    %41 = vector.load %arg8[%c0_20, %c0_21] : memref<128x128xf32, #tpu.memory_space<vmem>>, vector<128x128xf32>
    %cst_22 = arith.constant dense<0.000000e+00> : vector<8x128xf32>
    %42 = tpu.matmul %38, %41, %cst_22 {dimension_numbers = #tpu.dot_dimension_numbers<[1], [0], [0], [1], [0, 0, 1, 1], [], []>} : vector<8x128xf32>, vector<128x128xf32>, vector<8x128xf32> -> vector<8x128xf32>
    %c0_23 = arith.constant 0 : index
    %c0_24 = arith.constant 0 : index
    %43 = vector.load %arg9[%c0_23, %c0_24] : memref<1x128xf32, #tpu.memory_space<vmem>>, vector<1x128xf32>
    %44 = vector.broadcast %43 : vector<1x128xf32> to vector<8x128xf32>
    %45 = arith.addf %42, %44 : vector<8x128xf32>
    %c0_25 = arith.constant 0 : index
    %c0_26 = arith.constant 0 : index
    %c0_27 = arith.constant 0 : index
    %46 = vector.load %arg10[%c0_25, %c0_26, %c0_27] : memref<1x8x128xf32, #tpu.memory_space<vmem>>, vector<1x8x128xf32>
    %47 = vector.shape_cast %46 : vector<1x8x128xf32> to vector<8x128xf32>
    %48 = vector.shape_cast %45 : vector<8x128xf32> to vector<1x8x128xf32>
    tpu.vector_store %arg10[%c0_25, %c0_26, %c0_27], %48 {strides = array<i32>} : memref<1x8x128xf32, #tpu.memory_space<vmem>>, vector<1x8x128xf32>,
    %49 = tpu.iota {dimensions = array<i32: 1>} : vector<8x128xi32>
    %50 = arith.sitofp %49 : vector<8x128xi32> to vector<8x128xf32>
    %cst_28 = arith.constant dense<0xFF800000> : vector<8xf32>
    %51 = vector.multi_reduction <maximumf>, %45, %cst_28 [1] : vector<8x128xf32> to vector<8xf32>
    %52 = vector.shape_cast %51 : vector<8xf32> to vector<8x1xf32>
    %53 = vector.broadcast %52 : vector<8x1xf32> to vector<8x128xf32>
    %54 = arith.cmpf oeq, %45, %53 : vector<8x128xf32>
    %cst_29 = arith.constant 1.280000e+02 : f32
    %55 = vector.broadcast %cst_29 : f32 to vector<8x128xf32>
    %56 = arith.select %54, %50, %55 : vector<8x128xi1>, vector<8x128xf32>
    %cst_30 = arith.constant dense<0x7F800000> : vector<8xf32>
    %57 = vector.multi_reduction <minimumf>, %56, %cst_30 [1] : vector<8x128xf32> to vector<8xf32>
    %58 = vector.shape_cast %57 : vector<8xf32> to vector<8x1xf32>
    %59 = vector.broadcast %58 : vector<8x1xf32> to vector<8x128xf32>
    %60 = arith.cmpf oeq, %50, %59 : vector<8x128xf32>
    %61 = arith.extui %60 : vector<8x128xi1> to vector<8x128xi32>
    %62 = arith.sitofp %61 : vector<8x128xi32> to vector<8x128xf32>
    %c1_i32 = arith.constant 1 : i32
    %63 = arith.addi %arg0, %c1_i32 : i32
    %64 = arith.index_cast %63 : i32 to index
    %65 = memref.load %arg1[%64] : memref<8xi32, #tpu.memory_space<smem>>
    %c0_i32_31 = arith.constant 0 : i32
    %66 = arith.cmpi sgt, %65, %c0_i32_31 : i32
    %67 = arith.extui %66 : i1 to i32
    %68 = arith.sitofp %67 : i32 to f32
    %c1_i32_32 = arith.constant 1 : i32
    %69 = arith.addi %arg0, %c1_i32_32 : i32
    %70 = arith.index_cast %69 : i32 to index
    %c0_33 = arith.constant 0 : index
    %c0_34 = arith.constant 0 : index
    %71 = vector.load %arg4[%70, %c0_33, %c0_34] : memref<8x8x128xf32, #tpu.memory_space<vmem>>, vector<1x8x128xf32>
    %72 = vector.shape_cast %71 : vector<1x8x128xf32> to vector<8x128xf32>
    %73 = vector.broadcast %68 : f32 to vector<8x128xf32>
    %74 = arith.mulf %73, %72 : vector<8x128xf32>
    %cst_35 = arith.constant 1.000000e+00 : f32
    %75 = arith.subf %cst_35, %68 : f32
    %76 = vector.broadcast %75 : f32 to vector<8x128xf32>
    %77 = arith.mulf %76, %62 : vector<8x128xf32>
    %78 = arith.addf %74, %77 : vector<8x128xf32>
    %c0_36 = arith.constant 0 : index
    %c0_37 = arith.constant 0 : index
    %79 = vector.load %arg13[%c0_36, %c0_37] : memref<8x128xf32, #tpu.memory_space<vmem>>, vector<8x128xf32>
    tpu.vector_store %arg13[%c0_36, %c0_37], %78 {strides = array<i32>} : memref<8x128xf32, #tpu.memory_space<vmem>>, vector<8x128xf32>,
    return
  }
  func.func @transform_0(%arg0: i32, %arg1: memref<8xi32, #tpu.memory_space<smem>>) -> (i32, i32) {
    %c0_i32 = arith.constant 0 : i32
    %c0_i32_0 = arith.constant 0 : i32
    %c0_i32_1 = arith.constant 0 : i32
    return %c0_i32, %c0_i32_0 : i32, i32
  }
  func.func @transform_1(%arg0: i32, %arg1: memref<8xi32, #tpu.memory_space<smem>>) -> (i32, i32) {
    %c0_i32 = arith.constant 0 : i32
    %c0_i32_0 = arith.constant 0 : i32
    %c0_i32_1 = arith.constant 0 : i32
    return %c0_i32, %c0_i32_0 : i32, i32
  }
  func.func @transform_2(%arg0: i32, %arg1: memref<8xi32, #tpu.memory_space<smem>>) -> (i32, i32, i32) {
    %c0_i32 = arith.constant 0 : i32
    %c0_i32_0 = arith.constant 0 : i32
    %c0_i32_1 = arith.constant 0 : i32
    %c0_i32_2 = arith.constant 0 : i32
    return %c0_i32, %c0_i32_0, %c0_i32_1 : i32, i32, i32
  }
  func.func @transform_3(%arg0: i32, %arg1: memref<8xi32, #tpu.memory_space<smem>>) -> (i32, i32) {
    %c0_i32 = arith.constant 0 : i32
    %c0_i32_0 = arith.constant 0 : i32
    %c0_i32_1 = arith.constant 0 : i32
    return %c0_i32, %c0_i32_0 : i32, i32
  }
  func.func @transform_4(%arg0: i32, %arg1: memref<8xi32, #tpu.memory_space<smem>>) -> (i32, i32) {
    %c0_i32 = arith.constant 0 : i32
    %c0_i32_0 = arith.constant 0 : i32
    %c0_i32_1 = arith.constant 0 : i32
    return %c0_i32, %c0_i32_0 : i32, i32
  }
  func.func @transform_5(%arg0: i32, %arg1: memref<8xi32, #tpu.memory_space<smem>>) -> (i32, i32) {
    %c0_i32 = arith.constant 0 : i32
    %c0_i32_0 = arith.constant 0 : i32
    %c0_i32_1 = arith.constant 0 : i32
    return %c0_i32, %c0_i32_0 : i32, i32
  }
  func.func @transform_6(%arg0: i32, %arg1: memref<8xi32, #tpu.memory_space<smem>>) -> (i32, i32) {
    %c0_i32 = arith.constant 0 : i32
    %c0_i32_0 = arith.constant 0 : i32
    %c0_i32_1 = arith.constant 0 : i32
    return %c0_i32, %c0_i32_0 : i32, i32
  }
  func.func @transform_7(%arg0: i32, %arg1: memref<8xi32, #tpu.memory_space<smem>>) -> (i32, i32) {
    %c0_i32 = arith.constant 0 : i32
    %c0_i32_0 = arith.constant 0 : i32
    %c0_i32_1 = arith.constant 0 : i32
    return %c0_i32, %c0_i32_0 : i32, i32
  }
  func.func @transform_8(%arg0: i32, %arg1: memref<8xi32, #tpu.memory_space<smem>>) -> (i32, i32, i32) {
    %c0_i32 = arith.constant 0 : i32
    %c0_i32_0 = arith.constant 0 : i32
    %c0_i32_1 = arith.constant 0 : i32
    return %arg0, %c0_i32, %c0_i32_0 : i32, i32, i32
  }
}

</mosaic_0001>

<bundles_post_ra>
// kernel: seq2seq_forward.2
= control target key start
LH: loop header
LB: loop body
LE: loop exit
PB: predicated region body
PF: predicated region fallthrough
CT: control target
= control target key end

     0   :  { %10 = vsyncpa [#allocation3], 0  ;;  %s735_s15 = smov 0   ;;  %s796_s0 = inlined_call_operand.vmem [shape: f32[6,8,128], index: 0, kind: input, shape index: {}]   ;;  %s797_s1 = inlined_call_operand.hbm [shape: f32[256,512], index: 1, kind: input, shape index: {}]   ;;  %s798_s2 = inlined_call_operand.vmem [shape: f32[1,512], index: 2, kind: input, shape index: {}]   ;;  %s799_s3 = inlined_call_operand.vmem [shape: f32[8,128], index: 3, kind: output, shape index: {0}]   ;;  %s800_s4 = inlined_call_operand.vmem [shape: f32[8,128], index: 4, kind: output, shape index: {1}]  }
   0x1 LB: > { %s142_s18 = sshll.u32 %s797_s1, 4  ;;  %s613_s19 = sadd.s32 4294967295, %s704_s15   ;;  %s704_s15 = sphi %s735_s15, %s16_s15   ;;  %s143_s18 = int_to_ptr.hbm [resolvable:$true] %s142_s18 }
   0x2   : > { %p614_p0 = scmp.ge.s32.totalorder %s704_s15, 1  ;;  %p131_p1 = scmp.lt.s32.totalorder %s704_s15, 7 }
   0x3   : > { %p615_p2 = scmp.ne.s32.totalorder %s613_s19, 0  ;;  %p634_p3 = scmp.eq.s32.totalorder %s613_s19, 0 }
   0x4   : > { %p132_p4 = pnand %p614_p0, %p131_p1  ;;  %s706_s20 = smov [#allocation2]  }
   0x5   : > { %s144_s21 = sshll.u32 %s706_s20, 4  ;;  %s707_s22 = smov 512   ;;  %s145_s21 = int_to_ptr.vmem [resolvable:$true] %s144_s21 }
   0x6   : > { %p630_p5 = pneg %p132_p4  ;;  %s708_s23 = smov 32  }
   0x7   : > { %170 = sbr.rel (%p132_p4) target bundleno = 255 (0xff), region = 32 }
   0x8   : > { %p631_p6 = pnand %p634_p3, %p630_p5 }
   0xa   : > { %633 = dma.hbm_to_vmem [thread:$0]  (!%p631_p6), %s143_s18, 16384, %s145_s21, [#allocation3], %s707_s22, %s707_s22, %s708_s23  }
   0xc   : > { %699 = dma.done.wait (%p634_p3), [#allocation3], 16384  }
   0xd   : > { %701 = vsyncadd (%p634_p3), [#allocation3], 4294950912  ;;  %p191_p7 = scmp.lt.s32.totalorder %s613_s19, 5 }
   0xe   : > { %198 = sbr.rel (%p615_p2) target bundleno = 22 (0x16), region = 40 }
   0xf   : > { %s192_s24 = scalar_select %p191_p7, %s613_s19, 5 }
  0x11   : > { %s619_s25 = sshll.u32 %s192_s24, 3 }
  0x12   : > { %s749_s28 = scalar_lea.vmem %s796_s0, %s619_s25 }
  0x13   : > { %v709_v0 = vmov 0.0  }
  0x14   : > { %199 = vst [vmem:[%s799_s3] sm:$0xff] %v709_v0 }
  0x15   : > { %200 = vst [vmem:[%s800_s4] sm:$0xff] %v709_v0 }
  0x16 PF: > { %v264_v1 = vld [vmem:[#allocation2 + $0x1e8] sm:$0xff]  ;;  %v263_v4 = vld [vmem:[#allocation2 + $0x1e0] sm:$0xff]  ;;  %v266_v62 = vld [vmem:[#allocation2 + $0x1f8] sm:$0xff] }
  0x17   : > { %v260_v2 = vld [vmem:[#allocation2 + $0x1c8] sm:$0xff]  ;;  %381 = vmatpush.msra.mxu2 %v264_v1  ;;  %341 = vmatpush.msra.mxu0 %v263_v4  ;;  %v259_v7 = vld [vmem:[#allocation2 + $0x1c0] sm:$0xff]  ;;  %v330_v1 = vld [vmem:[#allocation2 + $0x3f8] sm:$0xff] }
  0x18   : > { %v328_v3 = vld [vmem:[#allocation2 + $0x3e8] sm:$0xff]  ;;  %v327_v8 = vld [vmem:[#allocation2 + $0x3e0] sm:$0xff] }
  0x19   : > { %401 = vmatpush.msra.mxu3 %v328_v3  ;;  %v324_v5 = vld [vmem:[#allocation2 + $0x3c8] sm:$0xff]  ;;  %382 = vmatpush.msra.mxu2 %v260_v2  ;;  %v255_v10 = vld [vmem:[#allocation2 + $0x1a0] sm:$0xff]  ;;  %v262_v2 = vld [vmem:[#allocation2 + $0x1d8] sm:$0xff] }
  0x1a   : > { %v256_v6 = vld [vmem:[#allocation2 + $0x1a8] sm:$0xff]  ;;  %v323_v11 = vld [vmem:[#allocation2 + $0x3c0] sm:$0xff]  ;;  %342 = vmatpush.msra.mxu0 %v259_v7  ;;  %361 = vmatpush.msra.mxu1 %v327_v8  ;;  %v265_v3 = vld [vmem:[#allocation2 + $0x1f0] sm:$0xff] }
  0x1b   : > { %402 = vmatpush.msra.mxu3 %v324_v5  ;;  %v320_v9 = vld [vmem:[#allocation2 + $0x3a8] sm:$0xff]  ;;  %383 = vmatpush.msra.mxu2 %v256_v6  ;;  %v251_v14 = vld [vmem:[#allocation2 + $0x180] sm:$0xff]  ;;  %v326_v5 = vld [vmem:[#allocation2 + $0x3d8] sm:$0xff] }
  0x1c   : > { %v252_v12 = vld [vmem:[#allocation2 + $0x188] sm:$0xff]  ;;  %v319_v15 = vld [vmem:[#allocation2 + $0x3a0] sm:$0xff]  ;;  %343 = vmatpush.msra.mxu0 %v255_v10  ;;  %362 = vmatpush.msra.mxu1 %v323_v11  ;;  %v258_v6 = vld [vmem:[#allocation2 + $0x1b8] sm:$0xff] }
  0x1d   : > { %v316_v13 = vld [vmem:[#allocation2 + $0x388] sm:$0xff]  ;;  %403 = vmatpush.msra.mxu3 %v320_v9  ;;  %384 = vmatpush.msra.mxu2 %v252_v12  ;;  %v247_v18 = vld [vmem:[#allocation2 + $0x160] sm:$0xff]  ;;  %v261_v7 = vld [vmem:[#allocation2 + $0x1d0] sm:$0xff] }
  0x1e   : > { %v248_v16 = vld [vmem:[#allocation2 + $0x168] sm:$0xff]  ;;  %v315_v19 = vld [vmem:[#allocation2 + $0x380] sm:$0xff]  ;;  %344 = vmatpush.msra.mxu0 %v251_v14  ;;  %363 = vmatpush.msra.mxu1 %v319_v15  ;;  %v329_v8 = vld [vmem:[#allocation2 + $0x3f0] sm:$0xff] }
  0x1f   : > { %v312_v17 = vld [vmem:[#allocation2 + $0x368] sm:$0xff]  ;;  %404 = vmatpush.msra.mxu3 %v316_v13  ;;  %385 = vmatpush.msra.mxu2 %v248_v16  ;;  %v243_v22 = vld [vmem:[#allocation2 + $0x140] sm:$0xff]  ;;  %v322_v9 = vld [vmem:[#allocation2 + $0x3b8] sm:$0xff] }
  0x20   : > { %v244_v20 = vld [vmem:[#allocation2 + $0x148] sm:$0xff]  ;;  %v311_v23 = vld [vmem:[#allocation2 + $0x360] sm:$0xff]  ;;  %345 = vmatpush.msra.mxu0 %v247_v18  ;;  %364 = vmatpush.msra.mxu1 %v315_v19  ;;  %v254_v10 = vld [vmem:[#allocation2 + $0x198] sm:$0xff] }
  0x21   : > { %v308_v21 = vld [vmem:[#allocation2 + $0x348] sm:$0xff]  ;;  %405 = vmatpush.msra.mxu3 %v312_v17  ;;  %386 = vmatpush.msra.mxu2 %v244_v20  ;;  %v239_v26 = vld [vmem:[#allocation2 + $0x120] sm:$0xff]  ;;  %v257_v11 = vld [vmem:[#allocation2 + $0x1b0] sm:$0xff] }
  0x22   : > { %v240_v24 = vld [vmem:[#allocation2 + $0x128] sm:$0xff]  ;;  %v307_v27 = vld [vmem:[#allocation2 + $0x340] sm:$0xff]  ;;  %346 = vmatpush.msra.mxu0 %v243_v22  ;;  %365 = vmatpush.msra.mxu1 %v311_v23  ;;  %v325_v13 = vld [vmem:[#allocation2 + $0x3d0] sm:$0xff] }
  0x23   : > { %v304_v25 = vld [vmem:[#allocation2 + $0x328] sm:$0xff]  ;;  %406 = vmatpush.msra.mxu3 %v308_v21  ;;  %387 = vmatpush.msra.mxu2 %v240_v24  ;;  %v235_v30 = vld [vmem:[#allocation2 + $0x100] sm:$0xff]  ;;  %v250_v14 = vld [vmem:[#allocation2 + $0x178] sm:$0xff] }
  0x24   : > { %v236_v28 = vld [vmem:[#allocation2 + $0x108] sm:$0xff]  ;;  %v303_v31 = vld [vmem:[#allocation2 + $0x320] sm:$0xff]  ;;  %347 = vmatpush.msra.mxu0 %v239_v26  ;;  %366 = vmatpush.msra.mxu1 %v307_v27  ;;  %v318_v15 = vld [vmem:[#allocation2 + $0x398] sm:$0xff] }
  0x25   : > { %v300_v29 = vld [vmem:[#allocation2 + $0x308] sm:$0xff]  ;;  %407 = vmatpush.msra.mxu3 %v304_v25  ;;  %388 = vmatpush.msra.mxu2 %v236_v28  ;;  %v231_v34 = vld [vmem:[#allocation2 + $0xe0] sm:$0xff]  ;;  %v253_v17 = vld [vmem:[#allocation2 + $0x190] sm:$0xff] }
  0x26   : > { %v232_v32 = vld [vmem:[#allocation2 + $0xe8] sm:$0xff]  ;;  %v299_v35 = vld [vmem:[#allocation2 + $0x300] sm:$0xff]  ;;  %348 = vmatpush.msra.mxu0 %v235_v30  ;;  %367 = vmatpush.msra.mxu1 %v303_v31  ;;  %v321_v18 = vld [vmem:[#allocation2 + $0x3b0] sm:$0xff] }
  0x27   : > { %v296_v33 = vld [vmem:[#allocation2 + $0x2e8] sm:$0xff]  ;;  %408 = vmatpush.msra.mxu3 %v300_v29  ;;  %389 = vmatpush.msra.mxu2 %v232_v32  ;;  %v227_v38 = vld [vmem:[#allocation2 + $0xc0] sm:$0xff]  ;;  %v246_v19 = vld [vmem:[#allocation2 + $0x158] sm:$0xff] }
  0x28   : > { %v228_v36 = vld [vmem:[#allocation2 + $0xc8] sm:$0xff]  ;;  %v295_v39 = vld [vmem:[#allocation2 + $0x2e0] sm:$0xff]  ;;  %349 = vmatpush.msra.mxu0 %v231_v34  ;;  %368 = vmatpush.msra.mxu1 %v299_v35  ;;  %v314_v20 = vld [vmem:[#allocation2 + $0x378] sm:$0xff] }
  0x29   : > { %v292_v37 = vld [vmem:[#allocation2 + $0x2c8] sm:$0xff]  ;;  %409 = vmatpush.msra.mxu3 %v296_v33  ;;  %390 = vmatpush.msra.mxu2 %v228_v36  ;;  %v223_v42 = vld [vmem:[#allocation2 + $0xa0] sm:$0xff]  ;;  %v249_v21 = vld [vmem:[#allocation2 + $0x170] sm:$0xff] }
  0x2a   : > { %v224_v40 = vld [vmem:[#allocation2 + $0xa8] sm:$0xff]  ;;  %v291_v43 = vld [vmem:[#allocation2 + $0x2c0] sm:$0xff]  ;;  %350 = vmatpush.msra.mxu0 %v227_v38  ;;  %369 = vmatpush.msra.mxu1 %v295_v39  ;;  %v317_v22 = vld [vmem:[#allocation2 + $0x390] sm:$0xff] }
  0x2b   : > { %v288_v41 = vld [vmem:[#allocation2 + $0x2a8] sm:$0xff]  ;;  %410 = vmatpush.msra.mxu3 %v292_v37  ;;  %391 = vmatpush.msra.mxu2 %v224_v40  ;;  %v219_v46 = vld [vmem:[#allocation2 + $0x80] sm:$0xff]  ;;  %v242_v23 = vld [vmem:[#allocation2 + $0x138] sm:$0xff] }
  0x2c   : > { %v220_v44 = vld [vmem:[#allocation2 + $0x88] sm:$0xff]  ;;  %v287_v47 = vld [vmem:[#allocation2 + $0x2a0] sm:$0xff]  ;;  %351 = vmatpush.msra.mxu0 %v223_v42  ;;  %370 = vmatpush.msra.mxu1 %v291_v43  ;;  %v310_v24 = vld [vmem:[#allocation2 + $0x358] sm:$0xff] }
  0x2d   : > { %v284_v45 = vld [vmem:[#allocation2 + $0x288] sm:$0xff]  ;;  %411 = vmatpush.msra.mxu3 %v288_v41  ;;  %392 = vmatpush.msra.mxu2 %v220_v44  ;;  %v215_v50 = vld [vmem:[#allocation2 + $0x60] sm:$0xff]  ;;  %v245_v25 = vld [vmem:[#allocation2 + $0x150] sm:$0xff] }
  0x2e   : > { %v216_v48 = vld [vmem:[#allocation2 + $0x68] sm:$0xff]  ;;  %v283_v51 = vld [vmem:[#allocation2 + $0x280] sm:$0xff]  ;;  %352 = vmatpush.msra.mxu0 %v219_v46  ;;  %371 = vmatpush.msra.mxu1 %v287_v47  ;;  %v313_v26 = vld [vmem:[#allocation2 + $0x370] sm:$0xff] }
  0x2f   : > { %v280_v49 = vld [vmem:[#allocation2 + $0x268] sm:$0xff]  ;;  %412 = vmatpush.msra.mxu3 %v284_v45  ;;  %393 = vmatpush.msra.mxu2 %v216_v48  ;;  %v211_v54 = vld [vmem:[#allocation2 + $0x40] sm:$0xff]  ;;  %v238_v27 = vld [vmem:[#allocation2 + $0x118] sm:$0xff] }
  0x30   : > { %v212_v52 = vld [vmem:[#allocation2 + $0x48] sm:$0xff]  ;;  %v279_v55 = vld [vmem:[#allocation2 + $0x260] sm:$0xff]  ;;  %353 = vmatpush.msra.mxu0 %v215_v50  ;;  %372 = vmatpush.msra.mxu1 %v283_v51  ;;  %v306_v28 = vld [vmem:[#allocation2 + $0x338] sm:$0xff] }
  0x31   : > { %v276_v53 = vld [vmem:[#allocation2 + $0x248] sm:$0xff]  ;;  %413 = vmatpush.msra.mxu3 %v280_v49  ;;  %394 = vmatpush.msra.mxu2 %v212_v52  ;;  %v207_v58 = vld [vmem:[#allocation2 + $0x20] sm:$0xff]  ;;  %v241_v29 = vld [vmem:[#allocation2 + $0x130] sm:$0xff] }
  0x32   : > { %v208_v56 = vld [vmem:[#allocation2 + $0x28] sm:$0xff]  ;;  %v275_v59 = vld [vmem:[#allocation2 + $0x240] sm:$0xff]  ;;  %354 = vmatpush.msra.mxu0 %v211_v54  ;;  %373 = vmatpush.msra.mxu1 %v279_v55  ;;  %v309_v30 = vld [vmem:[#allocation2 + $0x350] sm:$0xff] }
  0x33   : > { %v272_v57 = vld [vmem:[#allocation2 + $0x228] sm:$0xff]  ;;  %414 = vmatpush.msra.mxu3 %v276_v53  ;;  %395 = vmatpush.msra.mxu2 %v208_v56  ;;  %v203_v63 = vld [vmem:[#allocation2] sm:$0xff]  ;;  %v234_v31 = vld [vmem:[#allocation2 + $0xf8] sm:$0xff] }
  0x34   : > { %v204_v60 = vld [vmem:[#allocation2 + $0x8] sm:$0xff]  ;;  %355 = vmatpush.msra.mxu0 %v207_v58  ;;  %374 = vmatpush.msra.mxu1 %v275_v59  ;;  %v271_v0 = vld [vmem:[#allocation2 + $0x220] sm:$0xff]  ;;  %v302_v32 = vld [vmem:[#allocation2 + $0x318] sm:$0xff] }
  0x35   : > { %v268_v61 = vld [vmem:[#allocation2 + $0x208] sm:$0xff]  ;;  %415 = vmatpush.msra.mxu3 %v272_v57  ;;  %396 = vmatpush.msra.mxu2 %v204_v60  ;;  %v267_v4 = vld [vmem:[#allocation2 + $0x200] sm:$0xff]  ;;  %v237_v33 = vld [vmem:[#allocation2 + $0x110] sm:$0xff] }
  0x36   : > { %356 = vmatpush.msra.mxu0 %v203_v63  ;;  %375 = vmatpush.msra.mxu1 %v271_v0  ;;  %v759_v12 = vld [vmem:[%s749_s28] sm:$0xff]  ;;  %v305_v34 = vld [vmem:[#allocation2 + $0x330] sm:$0xff]  ;;  %v230_v35 = vld [vmem:[#allocation2 + $0xd8] sm:$0xff] }
  0x37   : > { %416 = vmatpush.msra.mxu3 %v268_v61  ;;  %461 = vmatpush.msrb.mxu2 %v266_v62  ;;  %v764_v16 = vld [vmem:[%s799_s3] sm:$0xff]  ;;  %v298_v36 = vld [vmem:[#allocation2 + $0x2f8] sm:$0xff]  ;;  %v233_v37 = vld [vmem:[#allocation2 + $0xf0] sm:$0xff] }
  0x38   : > { %421 = vmatpush.msrb.mxu0 %v265_v3  ;;  %376 = vmatpush.msra.mxu1 %v267_v4  ;;  %v301_v38 = vld [vmem:[#allocation2 + $0x310] sm:$0xff]  ;;  %v226_v39 = vld [vmem:[#allocation2 + $0xb8] sm:$0xff]  ;;  %v331_v3 = vld [vmem:[%s798_s2] sm:$0xf] }
  0x39   : > { %481 = vmatpush.msrb.mxu3 %v330_v1  ;;  %462 = vmatpush.msrb.mxu2 %v262_v2  ;;  %v294_v40 = vld [vmem:[#allocation2 + $0x2d8] sm:$0xff]  ;;  %v229_v41 = vld [vmem:[#allocation2 + $0xd0] sm:$0xff]  ;;  %v333_v4 = vperm.slane %v331_v3, 0 }
  0x3a   : > { %422 = vmatpush.msrb.mxu0 %v261_v7  ;;  %441 = vmatpush.msrb.mxu1 %v329_v8  ;;  %v297_v42 = vld [vmem:[#allocation2 + $0x2f0] sm:$0xff]  ;;  %v222_v43 = vld [vmem:[#allocation2 + $0x98] sm:$0xff] }
  0x3b   : > { %482 = vmatpush.msrb.mxu3 %v326_v5  ;;  %463 = vmatpush.msrb.mxu2 %v258_v6  ;;  %v290_v44 = vld [vmem:[#allocation2 + $0x2b8] sm:$0xff]  ;;  %v225_v45 = vld [vmem:[#allocation2 + $0xb0] sm:$0xff]  ;;  %v334_v5 = vperm.slane %v331_v3, 1 }
  0x3c   : > { %423 = vmatpush.msrb.mxu0 %v257_v11  ;;  %397 = vmatmul.f32.vlgmr.msra.gmra.mxu2 %v759_v12  ;;  %v293_v46 = vld [vmem:[#allocation2 + $0x2d0] sm:$0xff]  ;;  %v218_v47 = vld [vmem:[#allocation2 + $0x78] sm:$0xff] }
  0x3d   : > { %483 = vmatpush.msrb.mxu3 %v322_v9  ;;  %464 = vmatpush.msrb.mxu2 %v254_v10  ;;  %v286_v48 = vld [vmem:[#allocation2 + $0x298] sm:$0xff]  ;;  %v221_v49 = vld [vmem:[#allocation2 + $0x90] sm:$0xff] }
  0x3e   : > { %442 = vmatpush.msrb.mxu1 %v325_v13  ;;  %417 = vmatmul.f32.vlgmr.msra.gmra.mxu3 %v764_v16  ;;  %v289_v50 = vld [vmem:[#allocation2 + $0x2b0] sm:$0xff]  ;;  %v214_v51 = vld [vmem:[#allocation2 + $0x58] sm:$0xff] }
  0x3f   : > { %465 = vmatpush.msrb.mxu2 %v250_v14  ;;  %484 = vmatpush.msrb.mxu3 %v318_v15  ;;  %v282_v52 = vld [vmem:[#allocation2 + $0x278] sm:$0xff]  ;;  %v217_v53 = vld [vmem:[#allocation2 + $0x70] sm:$0xff] }
  0x40   : > { %424 = vmatpush.msrb.mxu0 %v253_v17  ;;  %443 = vmatpush.msrb.mxu1 %v321_v18  ;;  %v285_v54 = vld [vmem:[#allocation2 + $0x290] sm:$0xff]  ;;  %v210_v55 = vld [vmem:[#allocation2 + $0x38] sm:$0xff] }
  0x41   : > { %466 = vmatpush.msrb.mxu2 %v246_v19  ;;  %485 = vmatpush.msrb.mxu3 %v314_v20  ;;  %v278_v56 = vld [vmem:[#allocation2 + $0x258] sm:$0xff]  ;;  %v213_v57 = vld [vmem:[#allocation2 + $0x50] sm:$0xff]  ;;  %v335_v20 = vperm.slane %v331_v3, 2 }
  0x42   : > { %425 = vmatpush.msrb.mxu0 %v249_v21  ;;  %444 = vmatpush.msrb.mxu1 %v317_v22  ;;  %v281_v58 = vld [vmem:[#allocation2 + $0x270] sm:$0xff]  ;;  %v206_v59 = vld [vmem:[#allocation2 + $0x18] sm:$0xff] }
  0x43   : > { %467 = vmatpush.msrb.mxu2 %v242_v23  ;;  %486 = vmatpush.msrb.mxu3 %v310_v24  ;;  %v274_v60 = vld [vmem:[#allocation2 + $0x238] sm:$0xff]  ;;  %v209_v61 = vld [vmem:[#allocation2 + $0x30] sm:$0xff] }
  0x44   : > { %357 = vmatmul.f32.vlgmr.msra.gmra.mxu0 %v759_v12  ;;  %445 = vmatpush.msrb.mxu1 %v313_v26  ;;  %v277_v62 = vld [vmem:[#allocation2 + $0x250] sm:$0xff]  ;;  %v270_v63 = vld [vmem:[#allocation2 + $0x218] sm:$0xff] }
  0x45   : > { %426 = vmatpush.msrb.mxu0 %v245_v25  ;;  %468 = vmatpush.msrb.mxu2 %v238_v27  ;;  %v205_v0 = vld [vmem:[#allocation2 + $0x10] sm:$0xff]  ;;  %v336_v25 = vperm.slane %v331_v3, 3 }
  0x46   : > { %487 = vmatpush.msrb.mxu3 %v306_v28  ;;  %377 = vmatmul.f32.vlgmr.msra.gmra.mxu1 %v764_v16  ;;  %v273_v1 = vld [vmem:[#allocation2 + $0x230] sm:$0xff] }
  0x47   : > { %427 = vmatpush.msrb.mxu0 %v241_v29  ;;  %446 = vmatpush.msrb.mxu1 %v309_v30  ;;  %v269_v2 = vld [vmem:[#allocation2 + $0x210] sm:$0xff] }
  0x48   : > { %469 = vmatpush.msrb.mxu2 %v234_v31  ;;  %488 = vmatpush.msrb.mxu3 %v302_v32 }
  0x49   : > { %428 = vmatpush.msrb.mxu0 %v237_v33  ;;  %447 = vmatpush.msrb.mxu1 %v305_v34 }
  0x4a   : > { %470 = vmatpush.msrb.mxu2 %v230_v35  ;;  %489 = vmatpush.msrb.mxu3 %v298_v36 }
  0x4b   : > { %429 = vmatpush.msrb.mxu0 %v233_v37  ;;  %448 = vmatpush.msrb.mxu1 %v301_v38 }
  0x4c   : > { %471 = vmatpush.msrb.mxu2 %v226_v39  ;;  %490 = vmatpush.msrb.mxu3 %v294_v40 }
  0x4d   : > { %430 = vmatpush.msrb.mxu0 %v229_v41  ;;  %449 = vmatpush.msrb.mxu1 %v297_v42 }
  0x4e   : > { %472 = vmatpush.msrb.mxu2 %v222_v43  ;;  %491 = vmatpush.msrb.mxu3 %v290_v44 }
  0x4f   : > { %431 = vmatpush.msrb.mxu0 %v225_v45  ;;  %450 = vmatpush.msrb.mxu1 %v293_v46 }
  0x50   : > { %473 = vmatpush.msrb.mxu2 %v218_v47  ;;  %492 = vmatpush.msrb.mxu3 %v286_v48  ;;  %v559_v47 = vld [vmem:[%s800_s4] sm:$0xff] }
  0x51   : > { %432 = vmatpush.msrb.mxu0 %v221_v49  ;;  %451 = vmatpush.msrb.mxu1 %v289_v50 }
  0x52   : > { %474 = vmatpush.msrb.mxu2 %v214_v51  ;;  %493 = vmatpush.msrb.mxu3 %v282_v52 }
  0x53   : > { %433 = vmatpush.msrb.mxu0 %v217_v53  ;;  %452 = vmatpush.msrb.mxu1 %v285_v54 }
  0x54   : > { %475 = vmatpush.msrb.mxu2 %v210_v55  ;;  %494 = vmatpush.msrb.mxu3 %v278_v56 }
  0x55   : > { %434 = vmatpush.msrb.mxu0 %v213_v57  ;;  %453 = vmatpush.msrb.mxu1 %v281_v58 }
  0x56   : > { %476 = vmatpush.msrb.mxu2 %v206_v59  ;;  %495 = vmatpush.msrb.mxu3 %v274_v60 }
  0x57   : > { %435 = vmatpush.msrb.mxu0 %v209_v61  ;;  %454 = vmatpush.msrb.mxu1 %v277_v62 }
  0x58   : > { %477 = vmatmul.f32.vlgmr.msrb.gmra.mxu2 %v759_v12  ;;  %496 = vmatpush.msrb.mxu3 %v270_v63 }
  0x59   : > { %436 = vmatpush.msrb.mxu0 %v205_v0  ;;  %455 = vmatpush.msrb.mxu1 %v273_v1 }
  0x5a   : > { %497 = vmatmul.f32.vlgmr.msrb.gmra.mxu3 %v764_v16  ;;  %437 = vmatmul.f32.vlgmr.msrb.gmra.mxu0 %v759_v12 }
  0x5b   : > { %456 = vmatpush.msrb.mxu1 %v269_v2 }
  0x5c   : > { %457 = vmatmul.f32.vlgmr.msrb.gmra.mxu1 %v764_v16 }
  0xbf   : > { %v398_v7 = vpop.f32.mrf.mxu2 }
  0xc0   : > { %v399_v9 = vadd.f32 %v398_v7, %v334_v5 }
  0xc1   : > { %v358_v6 = vpop.f32.mrf.mxu0  ;;  %v418_v10 = vpop.f32.mrf.mxu3 }
  0xc2   : > { %v359_v8 = vadd.f32 %v358_v6, %v333_v4  ;;  %v419_v13 = vadd.f32 %v418_v10, %v399_v9 }
  0xc3   : > { %v378_v11 = vpop.f32.mrf.mxu1 }
  0xc4   : > { %v379_v14 = vadd.f32 %v378_v11, %v359_v8  ;;  %v622_v15 = vmul.f32 -1.442695, %v419_v13 }
  0xc6   : > { %v621_v17 = vmul.f32 -1.442695, %v379_v14  ;;  %648 = vpow2.f32 %v622_v15 }
  0xc8   : > { %650 = vpow2.f32 %v621_v17 }
  0xcc   : > { %v649_v12 = vpop.eup %648 }
  0xcd   : > { %v523_v18 = vadd.f32 1.0, %v649_v12 }
  0xce   : > { %v651_v16 = vpop.eup %650 }
  0xcf   : > { %v504_v19 = vadd.f32 1.0, %v651_v16  ;;  %652 = vrcp.f32 %v523_v18  ;;  %vm529_vm0 = vweird.f32 %v523_v18  ;;  %v535_v27 = vand.u32 2147483648, %v523_v18 }
  0xd0   : > { %v533_v29 = vand.u32 2147483647, %v523_v18 }
  0xd1   : > { %654 = vrcp.f32 %v504_v19  ;;  %vm510_vm2 = vweird.f32 %v504_v19  ;;  %v516_v32 = vand.u32 2147483648, %v504_v19  ;;  %v514_v35 = vand.u32 2147483647, %v504_v19 }
  0xd2   : > { %v536_v40 = vor.u32 1.1754944e-38, %v535_v27  ;;  %vm534_vm6 = vcmp.eq.f32.partialorder %v533_v29, 8.507059e+37 }
  0xd3   : > { %v517_v43 = vor.u32 1.1754944e-38, %v516_v32  ;;  %vm515_vm7 = vcmp.eq.f32.partialorder %v514_v35, 8.507059e+37 }
  0xd5   : > { %v653_v21 = vpop.eup %652 }
  0xd6   : > { %v525_v23 = vmul.f32 %v653_v21, %v523_v18  ;;  %vm530_vm1 = vweird.f32 %v653_v21 }
  0xd7   : > { %v655_v22 = vpop.eup %654  ;;  %v438_v24 = vpop.f32.mrf.mxu0  ;;  %vm778_vm4 = vmor %vm529_vm0, %vm530_vm1 }
  0xd8   : > { %v506_v26 = vmul.f32 %v655_v22, %v504_v19  ;;  %v439_v28 = vadd.f32 %v438_v24, %v335_v20  ;;  %v526_v30 = vsub.f32 1.0, %v525_v23  ;;  %vm511_vm3 = vweird.f32 %v655_v22 }
  0xd9   : > { %v458_v31 = vpop.f32.mrf.mxu1  ;;  %vm512_vm5 = vmor %vm510_vm2, %vm511_vm3 }
  0xda   : > { %v507_v33 = vsub.f32 1.0, %v506_v26  ;;  %v459_v34 = vadd.f32 %v458_v31, %v439_v28  ;;  %v527_v37 = vmul.f32 %v653_v21, %v526_v30 }
  0xdb   : > { %v478_v36 = vpop.f32.mrf.mxu2 }
  0xdc   : > { %v479_v38 = vadd.f32 %v478_v36, %v336_v25  ;;  %v508_v41 = vmul.f32 %v655_v22, %v507_v33  ;;  %656 = vtanh.f32 %v459_v34  ;;  %v528_v44 = vadd.f32 %v653_v21, %v527_v37 }
  0xdd   : > { %v498_v42 = vpop.f32.mrf.mxu3 }
  0xde   : > { %v499_v45 = vadd.f32 %v498_v42, %v479_v38  ;;  %v509_v46 = vadd.f32 %v655_v22, %v508_v41  ;;  %v532_v48 = vsel %vm778_vm4, %v653_v21, %v528_v44 }
  0xdf   : > { %v537_v51 = vsel %vm534_vm6, %v536_v40, %v532_v48 }
  0xe0   : > { %v623_v49 = vmul.f32 -1.442695, %v499_v45  ;;  %v513_v50 = vsel %vm512_vm5, %v655_v22, %v509_v46  ;;  %v560_v53 = vmul.f32 %v559_v47, %v537_v51 }
  0xe1   : > { %v518_v52 = vsel %vm515_vm7, %v517_v43, %v513_v50 }
  0xe2   : > { %658 = vpow2.f32 %v623_v49  ;;  %v657_v54 = vpop.eup %656 }
  0xe3   : > { %v561_v55 = vmul.f32 %v657_v54, %v518_v52 }
  0xe5   : > { %v562_v56 = vadd.f32 %v561_v55, %v560_v53 }
  0xe7   : > { %566 = vst [vmem:[%s800_s4] sm:$0xff] %v562_v56 }
  0xe8   : > { %v659_v57 = vpop.eup %658 }
  0xe9   : > { %v543_v58 = vadd.f32 1.0, %v659_v57 }
  0xeb   : > { %660 = vrcp.f32 %v543_v58  ;;  %v555_v62 = vand.u32 2147483648, %v543_v58  ;;  %v553_v0 = vand.u32 2147483647, %v543_v58  ;;  %vm549_vm9 = vweird.f32 %v543_v58 }
  0xec   : > { %662 = vtanh.f32 %v562_v56 }
  0xed   : > { %v556_v2 = vor.u32 1.1754944e-38, %v555_v62  ;;  %vm554_vm11 = vcmp.eq.f32.partialorder %v553_v0, 8.507059e+37 }
  0xf1   : > { %v661_v59 = vpop.eup %660 }
  0xf2   : > { %v545_v60 = vmul.f32 %v661_v59, %v543_v58  ;;  %vm550_vm8 = vweird.f32 %v661_v59  ;;  %v663_v4 = vpop.eup %662 }
  0xf3   : > { %vm551_vm10 = vmor %vm549_vm9, %vm550_vm8 }
  0xf4   : > { %v546_v61 = vsub.f32 1.0, %v545_v60 }
  0xf6   : > { %v547_v63 = vmul.f32 %v661_v59, %v546_v61 }
  0xf8   : > { %v548_v1 = vadd.f32 %v661_v59, %v547_v63 }
  0xfa   : > { %v552_v3 = vsel %vm551_vm10, %v661_v59, %v548_v1 }
  0xfb   : > { %v557_v5 = vsel %vm554_vm11, %v556_v2, %v552_v3 }
  0xfc   : > { %v564_v6 = vmul.f32 %v663_v4, %v557_v5 }
  0xfe   : > { %565 = vst [vmem:[%s799_s3] sm:$0xff] %v564_v6 }
  0xff PF: > { %s16_s15 = sadd.s32 1, %s704_s15  }
 0x100   : > { %p13_p8 = scmp.ge.s32.totalorder %s16_s15, 8  }
 0x102   :  { %15 = sbr.rel (!%p13_p8) target bundleno = 1 (0x1), region = 75 }
 0x107   :  { %584 = vsyncpa [#allocation3], 1 }
 0x108   :  { %586 = vsyncpa [#allocation3 + $0x1], 1 }

// kernel: seq2seq_forward.3
= control target key start
LH: loop header
LB: loop body
LE: loop exit
PB: predicated region body
PF: predicated region fallthrough
CT: control target
= control target key end

     0   :  { %s958_s12 = smov [#allocation6]   ;;  %s1166_s0 = inlined_call_operand.vmem [shape: s32[8], index: 0, kind: input, shape index: {}]   ;;  %s1167_s1 = inlined_call_operand.vmem [shape: f32[8,128], index: 1, kind: input, shape index: {}]   ;;  %s1168_s2 = inlined_call_operand.vmem [shape: f32[8,128], index: 2, kind: input, shape index: {}]   ;;  %s1169_s3 = inlined_call_operand.vmem [shape: f32[8,8,128], index: 3, kind: input, shape index: {}]   ;;  %s1170_s4 = inlined_call_operand.vmem [shape: f32[128,128], index: 4, kind: input, shape index: {}]   ;;  %s1171_s5 = inlined_call_operand.hbm [shape: f32[256,512], index: 5, kind: input, shape index: {}]   ;;  %s1172_s6 = inlined_call_operand.vmem [shape: f32[1,512], index: 6, kind: input, shape index: {}]   ;;  %s1173_s7 = inlined_call_operand.vmem [shape: f32[128,128], index: 7, kind: input, shape index: {}]   ;;  %s1174_s8 = inlined_call_operand.vmem [shape: f32[1,128], index: 8, kind: input, shape index: {}]   ;;  %s1175_s9 = inlined_call_operand.vmem [shape: f32[7,8,128], index: 9, kind: output, shape index: {}]  }
   0x1   :  { %s15_s11 = sshll.u32 %s1166_s0, 4  ;;  %s16_s11 = int_to_ptr.vmem [resolvable:$true] %s15_s11 }
   0x2   :  { %18 = dma.vmem_to_smem %s16_s11, 16, %s958_s12, [#allocation5] }
   0x3   :  { %948 = dma.done.wait [#allocation5], 16 }
   0x4   :  { %949 = vsyncadd [#allocation5], 4294967280 }
   0x5   :  { %21 = sfence }
   0x6   :  { %22 = vsyncpa [#allocation8], 0  ;;  %s1016_s13 = smov 0  }
   0x7 LB: > { %s250_s0 = sshll.u32 %s1171_s5, 4  ;;  %s1025_s16 = sadd.s32 4294967295, %s956_s13   ;;  %s956_s13 = sphi %s1016_s13, %s28_s13   ;;  %s251_s0 = int_to_ptr.hbm [resolvable:$true] %s250_s0 }
   0x8   : > { %p848_p0 = scmp.ge.s32.totalorder %s956_s13, 1  ;;  %p227_p1 = scmp.lt.s32.totalorder %s956_s13, 8 }
   0x9   : > { %p849_p2 = scmp.ne.s32.totalorder %s1025_s16, 0  ;;  %p870_p3 = scmp.eq.s32.totalorder %s1025_s16, 0 }
   0xa   : > { %p228_p4 = pnand %p848_p0, %p227_p1  ;;  %s959_s17 = smov [#allocation7]  }
   0xb   : > { %s252_s18 = sshll.u32 %s959_s17, 4  ;;  %s960_s19 = smov 512   ;;  %s253_s18 = int_to_ptr.vmem [resolvable:$true] %s252_s18 }
   0xc   : > { %p866_p5 = pneg %p228_p4  ;;  %s961_s20 = smov 32  }
   0xd   : > { %277 = sbr.rel (%p228_p4) target bundleno = 733 (0x2dd), region = 52 }
   0xe   : > { %p867_p6 = pnand %p870_p3, %p866_p5 }
  0x10   : > { %869 = dma.hbm_to_vmem [thread:$0]  (!%p867_p6), %s251_s0, 16384, %s253_s18, [#allocation8], %s960_s19, %s960_s19, %s961_s20  }
  0x12   : > { %951 = dma.done.wait (%p870_p3), [#allocation8], 16384  }
  0x13   : > { %953 = vsyncadd (%p870_p3), [#allocation8], 4294950912  ;;  %p306_p7 = scmp.lt.s32.totalorder %s1025_s16, 6 }
  0x14   : > { %313 = sbr.rel (%p849_p2) target bundleno = 29 (0x1d), region = 60 }
  0x15   : > { %s307_s21 = scalar_select %p306_p7, %s1025_s16, 6 }
  0x17   : > { %s852_s22 = sshll.u32 %s307_s21, 3 }
  0x18   : > { %s1036_s25 = scalar_lea.vmem %s1175_s9, %s852_s22 }
  0x19   : > { %v314_v0 = vld [vmem:[%s1167_s1] sm:$0xff] }
  0x1a   : > { %v316_v1 = vld [vmem:[%s1168_s2] sm:$0xff]  ;;  %315 = vst [vmem:[#allocation2] sm:$0xff] %v314_v0 }
  0x1b   : > { %v318_v2 = vld [vmem:[%s1169_s3] sm:$0xff]  ;;  %317 = vst [vmem:[#allocation3] sm:$0xff] %v316_v1 }
  0x1c   : > { %319 = vst [vmem:[#allocation4] sm:$0xff] %v318_v2 }
  0x1d PF: > { %v336_v3 = vld [vmem:[%s1170_s4 + $0x78] sm:$0xff]  ;;  %v335_v4 = vld [vmem:[%s1170_s4 + $0x70] sm:$0xff]  ;;  %v334_v5 = vld [vmem:[%s1170_s4 + $0x68] sm:$0xff]  ;;  %s775_s23 = sadd.s32 1, %s1025_s16  ;;  %s858_s28 = sshll.u32 %s1025_s16, 3 }
  0x1e   : > { %337 = vmatpush.msra.mxu0 %v336_v3  ;;  %v333_v6 = vld [vmem:[%s1170_s4 + $0x60] sm:$0xff]  ;;  %v482_v7 = vld [vmem:[#allocation7 + $0x3e0] sm:$0xff]  ;;  %v331_v14 = vld [vmem:[%s1170_s4 + $0x50] sm:$0xff]  ;;  %s776_s24 = sld [smem:[#allocation6 + %s775_s23]]  ;;  %s817_s10 = scalar_lea.vmem %s1169_s3, %s858_s28 }
  0x1f   : > { %v332_v8 = vld [vmem:[%s1170_s4 + $0x58] sm:$0xff]  ;;  %516 = vmatpush.msra.mxu2 %v482_v7  ;;  %v419_v12 = vld [vmem:[#allocation7 + $0x1e8] sm:$0xff]  ;;  %v330_v19 = vld [vmem:[%s1170_s4 + $0x48] sm:$0xff] }
  0x20   : > { %338 = vmatpush.msra.mxu0 %v335_v4  ;;  %v478_v9 = vld [vmem:[#allocation7 + $0x3c0] sm:$0xff]  ;;  %536 = vmatpush.msra.mxu3 %v419_v12  ;;  %v415_v15 = vld [vmem:[#allocation7 + $0x1c8] sm:$0xff]  ;;  %v327_v31 = vld [vmem:[%s1170_s4 + $0x30] sm:$0xff] }
  0x21   : > { %v418_v10 = vld [vmem:[#allocation7 + $0x1e0] sm:$0xff]  ;;  %517 = vmatpush.msra.mxu2 %v478_v9  ;;  %v411_v18 = vld [vmem:[#allocation7 + $0x1a8] sm:$0xff]  ;;  %v326_v35 = vld [vmem:[%s1170_s4 + $0x28] sm:$0xff] }
  0x22   : > { %339 = vmatpush.msra.mxu0 %v334_v5  ;;  %496 = vmatpush.msra.mxu1 %v418_v10  ;;  %v474_v11 = vld [vmem:[#allocation7 + $0x3a0] sm:$0xff]  ;;  %v407_v22 = vld [vmem:[#allocation7 + $0x188] sm:$0xff]  ;;  %v323_v47 = vld [vmem:[%s1170_s4 + $0x10] sm:$0xff] }
  0x23   : > { %v414_v13 = vld [vmem:[#allocation7 + $0x1c0] sm:$0xff]  ;;  %518 = vmatpush.msra.mxu2 %v474_v11  ;;  %537 = vmatpush.msra.mxu3 %v415_v15  ;;  %v329_v23 = vld [vmem:[%s1170_s4 + $0x40] sm:$0xff]  ;;  %v322_v51 = vld [vmem:[%s1170_s4 + $0x8] sm:$0xff] }
  0x24   : > { %340 = vmatpush.msra.mxu0 %v333_v6  ;;  %v410_v16 = vld [vmem:[#allocation7 + $0x1a0] sm:$0xff]  ;;  %497 = vmatpush.msra.mxu1 %v414_v13  ;;  %v403_v26 = vld [vmem:[#allocation7 + $0x168] sm:$0xff]  ;;  %v320_v57 = vld [vmem:[#allocation4] sm:$0xff]  ;;  %p777_p8 = scmp.gt.s32.totalorder %s776_s24, 0 }
  0x25   : > { %v470_v17 = vld [vmem:[#allocation7 + $0x380] sm:$0xff]  ;;  %538 = vmatpush.msra.mxu3 %v411_v18  ;;  %v399_v30 = vld [vmem:[#allocation7 + $0x148] sm:$0xff]  ;;  %v484_v4 = vld [vmem:[#allocation7 + $0x3f0] sm:$0xff] }
  0x26   : > { %341 = vmatpush.msra.mxu0 %v332_v8  ;;  %v406_v20 = vld [vmem:[#allocation7 + $0x180] sm:$0xff]  ;;  %498 = vmatpush.msra.mxu1 %v410_v16  ;;  %v395_v34 = vld [vmem:[#allocation7 + $0x128] sm:$0xff]  ;;  %v480_v8 = vld [vmem:[#allocation7 + $0x3d0] sm:$0xff]  ;;  %s778_s26 = scalar_select %p777_p8, 1, 0 }
  0x27   : > { %v466_v21 = vld [vmem:[#allocation7 + $0x360] sm:$0xff]  ;;  %519 = vmatpush.msra.mxu2 %v470_v17  ;;  %539 = vmatpush.msra.mxu3 %v407_v22  ;;  %v391_v38 = vld [vmem:[#allocation7 + $0x108] sm:$0xff]  ;;  %v420_v10 = vld [vmem:[#allocation7 + $0x1f0] sm:$0xff] }
  0x28   : > { %342 = vmatpush.msra.mxu0 %v331_v14  ;;  %v402_v24 = vld [vmem:[#allocation7 + $0x160] sm:$0xff]  ;;  %499 = vmatpush.msra.mxu1 %v406_v20  ;;  %v325_v39 = vld [vmem:[%s1170_s4 + $0x20] sm:$0xff]  ;;  %v476_v12 = vld [vmem:[#allocation7 + $0x3b0] sm:$0xff]  ;;  %s779_s27 = scvt.s32.f32 %s778_s26 }
  0x29   : > { %v462_v25 = vld [vmem:[#allocation7 + $0x340] sm:$0xff]  ;;  %520 = vmatpush.msra.mxu2 %v466_v21  ;;  %540 = vmatpush.msra.mxu3 %v403_v26  ;;  %v387_v42 = vld [vmem:[#allocation7 + $0xe8] sm:$0xff]  ;;  %v421_v13 = vld [vmem:[#allocation7 + $0x1f8] sm:$0xff] }
  0x2a   : > { %343 = vmatpush.msra.mxu0 %v330_v19  ;;  %v328_v27 = vld [vmem:[%s1170_s4 + $0x38] sm:$0xff]  ;;  %500 = vmatpush.msra.mxu1 %v402_v24  ;;  %v383_v46 = vld [vmem:[#allocation7 + $0xc8] sm:$0xff]  ;;  %v416_v14 = vld [vmem:[#allocation7 + $0x1d0] sm:$0xff]  ;;  %s785_s11 = ssub.f32 1.0, %s779_s27 }
  0x2b   : > { %v398_v28 = vld [vmem:[#allocation7 + $0x140] sm:$0xff]  ;;  %521 = vmatpush.msra.mxu2 %v462_v25  ;;  %541 = vmatpush.msra.mxu3 %v399_v30  ;;  %v379_v50 = vld [vmem:[#allocation7 + $0xa8] sm:$0xff]  ;;  %v472_v16 = vld [vmem:[#allocation7 + $0x390] sm:$0xff] }
  0x2c   : > { %344 = vmatpush.msra.mxu0 %v329_v23  ;;  %v458_v29 = vld [vmem:[#allocation7 + $0x320] sm:$0xff]  ;;  %501 = vmatpush.msra.mxu1 %v398_v28  ;;  %v375_v54 = vld [vmem:[#allocation7 + $0x88] sm:$0xff]  ;;  %v417_v17 = vld [vmem:[#allocation7 + $0x1d8] sm:$0xff] }
  0x2d   : > { %v394_v32 = vld [vmem:[#allocation7 + $0x120] sm:$0xff]  ;;  %522 = vmatpush.msra.mxu2 %v458_v29  ;;  %542 = vmatpush.msra.mxu3 %v395_v34  ;;  %v321_v55 = vld [vmem:[%s1170_s4] sm:$0xff]  ;;  %v412_v18 = vld [vmem:[#allocation7 + $0x1b0] sm:$0xff] }
  0x2e   : > { %345 = vmatpush.msra.mxu0 %v328_v27  ;;  %v454_v33 = vld [vmem:[#allocation7 + $0x300] sm:$0xff]  ;;  %502 = vmatpush.msra.mxu1 %v394_v32  ;;  %v483_v59 = vld [vmem:[#allocation7 + $0x3e8] sm:$0xff]  ;;  %v468_v20 = vld [vmem:[#allocation7 + $0x370] sm:$0xff] }
  0x2f   : > { %v390_v36 = vld [vmem:[#allocation7 + $0x100] sm:$0xff]  ;;  %523 = vmatpush.msra.mxu2 %v454_v33  ;;  %543 = vmatpush.msra.mxu3 %v391_v38  ;;  %v371_v60 = vld [vmem:[#allocation7 + $0x68] sm:$0xff]  ;;  %v413_v21 = vld [vmem:[#allocation7 + $0x1b8] sm:$0xff] }
  0x30   : > { %346 = vmatpush.msra.mxu0 %v327_v31  ;;  %v450_v37 = vld [vmem:[#allocation7 + $0x2e0] sm:$0xff]  ;;  %503 = vmatpush.msra.mxu1 %v390_v36  ;;  %v479_v63 = vld [vmem:[#allocation7 + $0x3c8] sm:$0xff]  ;;  %v408_v22 = vld [vmem:[#allocation7 + $0x190] sm:$0xff] }
  0x31   : > { %v386_v40 = vld [vmem:[#allocation7 + $0xe0] sm:$0xff]  ;;  %524 = vmatpush.msra.mxu2 %v450_v37  ;;  %544 = vmatpush.msra.mxu3 %v387_v42  ;;  %v367_v0 = vld [vmem:[#allocation7 + $0x48] sm:$0xff]  ;;  %v464_v24 = vld [vmem:[#allocation7 + $0x350] sm:$0xff] }
  0x32   : > { %347 = vmatpush.msra.mxu0 %v326_v35  ;;  %v446_v41 = vld [vmem:[#allocation7 + $0x2c0] sm:$0xff]  ;;  %504 = vmatpush.msra.mxu1 %v386_v40  ;;  %v475_v3 = vld [vmem:[#allocation7 + $0x3a8] sm:$0xff]  ;;  %v409_v25 = vld [vmem:[#allocation7 + $0x198] sm:$0xff] }
  0x33   : > { %v324_v43 = vld [vmem:[%s1170_s4 + $0x18] sm:$0xff]  ;;  %525 = vmatpush.msra.mxu2 %v446_v41  ;;  %545 = vmatpush.msra.mxu3 %v383_v46  ;;  %v363_v5 = vld [vmem:[#allocation7 + $0x28] sm:$0xff]  ;;  %v404_v26 = vld [vmem:[#allocation7 + $0x170] sm:$0xff] }
  0x34   : > { %v382_v44 = vld [vmem:[#allocation7 + $0xc0] sm:$0xff]  ;;  %348 = vmatpush.msra.mxu0 %v325_v39  ;;  %v471_v7 = vld [vmem:[#allocation7 + $0x388] sm:$0xff]  ;;  %v460_v28 = vld [vmem:[#allocation7 + $0x330] sm:$0xff] }
  0x35   : > { %v442_v45 = vld [vmem:[#allocation7 + $0x2a0] sm:$0xff]  ;;  %505 = vmatpush.msra.mxu1 %v382_v44  ;;  %546 = vmatpush.msra.mxu3 %v379_v50  ;;  %v359_v9 = vld [vmem:[#allocation7 + $0x8] sm:$0xff]  ;;  %v405_v29 = vld [vmem:[#allocation7 + $0x178] sm:$0xff] }
  0x36   : > { %v378_v48 = vld [vmem:[#allocation7 + $0xa0] sm:$0xff]  ;;  %349 = vmatpush.msra.mxu0 %v324_v43  ;;  %526 = vmatpush.msra.mxu2 %v442_v45  ;;  %v467_v11 = vld [vmem:[#allocation7 + $0x368] sm:$0xff]  ;;  %v400_v30 = vld [vmem:[#allocation7 + $0x150] sm:$0xff] }
  0x37   : > { %v438_v49 = vld [vmem:[#allocation7 + $0x280] sm:$0xff]  ;;  %506 = vmatpush.msra.mxu1 %v378_v48  ;;  %547 = vmatpush.msra.mxu3 %v375_v54  ;;  %v463_v15 = vld [vmem:[#allocation7 + $0x348] sm:$0xff]  ;;  %v456_v32 = vld [vmem:[#allocation7 + $0x310] sm:$0xff] }
  0x38   : > { %v374_v52 = vld [vmem:[#allocation7 + $0x80] sm:$0xff]  ;;  %350 = vmatpush.msra.mxu0 %v323_v47  ;;  %527 = vmatpush.msra.mxu2 %v438_v49  ;;  %v459_v19 = vld [vmem:[#allocation7 + $0x328] sm:$0xff]  ;;  %v401_v33 = vld [vmem:[#allocation7 + $0x158] sm:$0xff] }
  0x39   : > { %v434_v53 = vld [vmem:[#allocation7 + $0x260] sm:$0xff]  ;;  %507 = vmatpush.msra.mxu1 %v374_v52  ;;  %548 = vmatpush.msra.mxu3 %v371_v60  ;;  %v455_v23 = vld [vmem:[#allocation7 + $0x308] sm:$0xff]  ;;  %v396_v34 = vld [vmem:[#allocation7 + $0x130] sm:$0xff] }
  0x3a   : > { %v370_v56 = vld [vmem:[#allocation7 + $0x60] sm:$0xff]  ;;  %351 = vmatpush.msra.mxu0 %v322_v51  ;;  %528 = vmatpush.msra.mxu2 %v434_v53  ;;  %v451_v27 = vld [vmem:[#allocation7 + $0x2e8] sm:$0xff]  ;;  %v452_v36 = vld [vmem:[#allocation7 + $0x2f0] sm:$0xff] }
  0x3b   : > { %v430_v58 = vld [vmem:[#allocation7 + $0x240] sm:$0xff]  ;;  %508 = vmatpush.msra.mxu1 %v370_v56  ;;  %549 = vmatpush.msra.mxu3 %v367_v0  ;;  %v447_v31 = vld [vmem:[#allocation7 + $0x2c8] sm:$0xff]  ;;  %v397_v37 = vld [vmem:[#allocation7 + $0x138] sm:$0xff] }
  0x3c   : > { %352 = vmatpush.msra.mxu0 %v321_v55  ;;  %v426_v61 = vld [vmem:[#allocation7 + $0x220] sm:$0xff]  ;;  %529 = vmatpush.msra.mxu2 %v430_v58  ;;  %v443_v35 = vld [vmem:[#allocation7 + $0x2a8] sm:$0xff]  ;;  %v392_v38 = vld [vmem:[#allocation7 + $0x110] sm:$0xff] }
  0x3d   : > { %v366_v62 = vld [vmem:[#allocation7 + $0x40] sm:$0xff]  ;;  %353 = vmatmul.f32.vlgmr.msra.gmra.mxu0 %v320_v57  ;;  %550 = vmatpush.msra.mxu3 %v363_v5  ;;  %v439_v39 = vld [vmem:[#allocation7 + $0x288] sm:$0xff]  ;;  %v448_v40 = vld [vmem:[#allocation7 + $0x2d0] sm:$0xff] }
  0x3e   : > { %556 = vmatpush.msrb.mxu0 %v483_v59  ;;  %v422_v1 = vld [vmem:[#allocation7 + $0x200] sm:$0xff]  ;;  %530 = vmatpush.msra.mxu2 %v426_v61  ;;  %v393_v41 = vld [vmem:[#allocation7 + $0x118] sm:$0xff]  ;;  %v388_v42 = vld [vmem:[#allocation7 + $0xf0] sm:$0xff] }
  0x3f   : > { %v362_v2 = vld [vmem:[#allocation7 + $0x20] sm:$0xff]  ;;  %509 = vmatpush.msra.mxu1 %v366_v62  ;;  %551 = vmatpush.msra.mxu3 %v359_v9  ;;  %v435_v43 = vld [vmem:[#allocation7 + $0x268] sm:$0xff]  ;;  %v444_v44 = vld [vmem:[#allocation7 + $0x2b0] sm:$0xff] }
  0x40   : > { %557 = vmatpush.msrb.mxu0 %v479_v63  ;;  %v358_v6 = vld [vmem:[#allocation7] sm:$0xff]  ;;  %531 = vmatpush.msra.mxu2 %v422_v1  ;;  %v389_v45 = vld [vmem:[#allocation7 + $0xf8] sm:$0xff]  ;;  %v384_v46 = vld [vmem:[#allocation7 + $0xd0] sm:$0xff] }
  0x41   : > { %510 = vmatpush.msra.mxu1 %v362_v2  ;;  %616 = vmatpush.msrb.mxu3 %v421_v13  ;;  %v431_v47 = vld [vmem:[#allocation7 + $0x248] sm:$0xff]  ;;  %v440_v48 = vld [vmem:[#allocation7 + $0x290] sm:$0xff]  ;;  %v385_v49 = vld [vmem:[#allocation7 + $0xd8] sm:$0xff] }
  0x42   : > { %558 = vmatpush.msrb.mxu0 %v475_v3  ;;  %596 = vmatpush.msrb.mxu2 %v484_v4  ;;  %v1097_v50 = vld [vmem:[#allocation2] sm:$0xff]  ;;  %v380_v52 = vld [vmem:[#allocation7 + $0xb0] sm:$0xff]  ;;  %v381_v54 = vld [vmem:[#allocation7 + $0xb8] sm:$0xff] }
  0x43   : > { %511 = vmatpush.msra.mxu1 %v358_v6  ;;  %617 = vmatpush.msrb.mxu3 %v417_v17  ;;  %v427_v51 = vld [vmem:[#allocation7 + $0x228] sm:$0xff]  ;;  %v436_v53 = vld [vmem:[#allocation7 + $0x270] sm:$0xff]  ;;  %v485_v56 = vld [vmem:[#allocation7 + $0x3f8] sm:$0xff] }
  0x44   : > { %559 = vmatpush.msrb.mxu0 %v471_v7  ;;  %597 = vmatpush.msrb.mxu2 %v480_v8  ;;  %v423_v55 = vld [vmem:[#allocation7 + $0x208] sm:$0xff]  ;;  %v481_v57 = vld [vmem:[#allocation7 + $0x3d8] sm:$0xff]  ;;  %v376_v63 = vld [vmem:[#allocation7 + $0x90] sm:$0xff] }
  0x45   : > { %576 = vmatpush.msrb.mxu1 %v420_v10  ;;  %618 = vmatpush.msrb.mxu3 %v413_v21  ;;  %v477_v58 = vld [vmem:[#allocation7 + $0x3b8] sm:$0xff]  ;;  %v432_v0 = vld [vmem:[#allocation7 + $0x250] sm:$0xff] }
  0x46   : > { %560 = vmatpush.msrb.mxu0 %v467_v11  ;;  %598 = vmatpush.msrb.mxu2 %v476_v12  ;;  %v473_v59 = vld [vmem:[#allocation7 + $0x398] sm:$0xff]  ;;  %v372_v3 = vld [vmem:[#allocation7 + $0x70] sm:$0xff] }
  0x47   : > { %577 = vmatpush.msrb.mxu1 %v416_v14  ;;  %619 = vmatpush.msrb.mxu3 %v409_v25  ;;  %v469_v60 = vld [vmem:[#allocation7 + $0x378] sm:$0xff]  ;;  %v428_v4 = vld [vmem:[#allocation7 + $0x230] sm:$0xff]  ;;  %v486_v25 = vld [vmem:[%s1172_s6] sm:$0xf] }
  0x48   : > { %561 = vmatpush.msrb.mxu0 %v463_v15  ;;  %599 = vmatpush.msrb.mxu2 %v472_v16  ;;  %v465_v61 = vld [vmem:[#allocation7 + $0x358] sm:$0xff]  ;;  %v368_v7 = vld [vmem:[#allocation7 + $0x50] sm:$0xff] }
  0x49   : > { %578 = vmatpush.msrb.mxu1 %v412_v18  ;;  %620 = vmatpush.msrb.mxu3 %v405_v29  ;;  %v461_v62 = vld [vmem:[#allocation7 + $0x338] sm:$0xff]  ;;  %v424_v8 = vld [vmem:[#allocation7 + $0x210] sm:$0xff] }
  0x4a   : > { %562 = vmatpush.msrb.mxu0 %v459_v19  ;;  %600 = vmatpush.msrb.mxu2 %v468_v20  ;;  %v377_v1 = vld [vmem:[#allocation7 + $0x98] sm:$0xff]  ;;  %v364_v11 = vld [vmem:[#allocation7 + $0x30] sm:$0xff] }
  0x4b   : > { %579 = vmatpush.msrb.mxu1 %v408_v22  ;;  %621 = vmatpush.msrb.mxu3 %v401_v33  ;;  %v457_v2 = vld [vmem:[#allocation7 + $0x318] sm:$0xff]  ;;  %v360_v14 = vld [vmem:[#allocation7 + $0x10] sm:$0xff]  ;;  %v737_v22 = vld [vmem:[%s1173_s7 + $0x78] sm:$0xff] }
  0x4c   : > { %563 = vmatpush.msrb.mxu0 %v455_v23  ;;  %601 = vmatpush.msrb.mxu2 %v464_v24  ;;  %v373_v5 = vld [vmem:[#allocation7 + $0x78] sm:$0xff]  ;;  %v735_v24 = vld [vmem:[%s1173_s7 + $0x68] sm:$0xff] }
  0x4d   : > { %580 = vmatpush.msrb.mxu1 %v404_v26  ;;  %622 = vmatpush.msrb.mxu3 %v397_v37  ;;  %v453_v6 = vld [vmem:[#allocation7 + $0x2f8] sm:$0xff]  ;;  %v734_v26 = vld [vmem:[%s1173_s7 + $0x60] sm:$0xff]  ;;  %v731_v33 = vld [vmem:[%s1173_s7 + $0x48] sm:$0xff] }
  0x4e   : > { %564 = vmatpush.msrb.mxu0 %v451_v27  ;;  %602 = vmatpush.msrb.mxu2 %v460_v28  ;;  %v369_v9 = vld [vmem:[#allocation7 + $0x58] sm:$0xff]  ;;  %v488_v27 = vperm.slane %v486_v25, 0  ;;  %v733_v28 = vld [vmem:[%s1173_s7 + $0x58] sm:$0xff] }
  0x4f   : > { %581 = vmatpush.msrb.mxu1 %v400_v30  ;;  %623 = vmatpush.msrb.mxu3 %v393_v41  ;;  %v449_v10 = vld [vmem:[#allocation7 + $0x2d8] sm:$0xff] }
  0x50   : > { %565 = vmatpush.msrb.mxu0 %v447_v31  ;;  %603 = vmatpush.msrb.mxu2 %v456_v32  ;;  %v365_v12 = vld [vmem:[#allocation7 + $0x38] sm:$0xff] }
  0x51   : > { %582 = vmatpush.msrb.mxu1 %v396_v34  ;;  %624 = vmatpush.msrb.mxu3 %v389_v45  ;;  %v445_v13 = vld [vmem:[#allocation7 + $0x2b8] sm:$0xff] }
  0x52   : > { %566 = vmatpush.msrb.mxu0 %v443_v35  ;;  %604 = vmatpush.msrb.mxu2 %v452_v36  ;;  %v361_v15 = vld [vmem:[#allocation7 + $0x18] sm:$0xff]  ;;  %v489_v35 = vperm.slane %v486_v25, 1  ;;  %v730_v36 = vld [vmem:[%s1173_s7 + $0x40] sm:$0xff] }
  0x53   : > { %583 = vmatpush.msrb.mxu1 %v392_v38  ;;  %625 = vmatpush.msrb.mxu3 %v385_v49  ;;  %v441_v16 = vld [vmem:[#allocation7 + $0x298] sm:$0xff] }
  0x54   : > { %567 = vmatpush.msrb.mxu0 %v439_v39  ;;  %605 = vmatpush.msrb.mxu2 %v448_v40  ;;  %v437_v17 = vld [vmem:[#allocation7 + $0x278] sm:$0xff]  ;;  %v729_v39 = vld [vmem:[%s1173_s7 + $0x38] sm:$0xff] }
  0x55   : > { %584 = vmatpush.msrb.mxu1 %v388_v42  ;;  %532 = vmatmul.f32.vlgmr.msra.gmra.mxu2 %v1097_v50  ;;  %v433_v18 = vld [vmem:[#allocation7 + $0x258] sm:$0xff] }
  0x56   : > { %568 = vmatpush.msrb.mxu0 %v435_v43  ;;  %606 = vmatpush.msrb.mxu2 %v444_v44  ;;  %v429_v19 = vld [vmem:[#allocation7 + $0x238] sm:$0xff]  ;;  %v727_v44 = vld [vmem:[%s1173_s7 + $0x28] sm:$0xff] }
  0x57   : > { %585 = vmatpush.msrb.mxu1 %v384_v46  ;;  %626 = vmatpush.msrb.mxu3 %v381_v54  ;;  %v425_v20 = vld [vmem:[#allocation7 + $0x218] sm:$0xff]  ;;  %v491_v46 = vperm.slane %v486_v25, 3 }
  0x58   : > { %569 = vmatpush.msrb.mxu0 %v431_v47  ;;  %607 = vmatpush.msrb.mxu2 %v440_v48  ;;  %v736_v23 = vld [vmem:[%s1173_s7 + $0x70] sm:$0xff]  ;;  %v726_v47 = vld [vmem:[%s1173_s7 + $0x20] sm:$0xff]  ;;  %v725_v48 = vld [vmem:[%s1173_s7 + $0x18] sm:$0xff] }
  0x59   : > { %586 = vmatpush.msrb.mxu1 %v380_v52  ;;  %627 = vmatpush.msrb.mxu3 %v377_v1  ;;  %v732_v29 = vld [vmem:[%s1173_s7 + $0x50] sm:$0xff] }
  0x5a   : > { %570 = vmatpush.msrb.mxu0 %v427_v51  ;;  %608 = vmatpush.msrb.mxu2 %v436_v53  ;;  %v728_v42 = vld [vmem:[%s1173_s7 + $0x30] sm:$0xff] }
  0x5b   : > { %587 = vmatpush.msrb.mxu1 %v376_v63  ;;  %628 = vmatpush.msrb.mxu3 %v373_v5 }
  0x5c   : > { %571 = vmatpush.msrb.mxu0 %v423_v55  ;;  %609 = vmatpush.msrb.mxu2 %v432_v0  ;;  %v723_v55 = vld [vmem:[%s1173_s7 + $0x8] sm:$0xff] }
  0x5d   : > { %572 = vmatmul.f32.vlgmr.msrb.gmra.mxu0 %v1097_v50  ;;  %588 = vmatpush.msrb.mxu1 %v372_v3 }
  0x5e   : > { %636 = vmatpush.msra.mxu0 %v485_v56  ;;  %610 = vmatpush.msrb.mxu2 %v428_v4 }
  0x5f   : > { %589 = vmatpush.msrb.mxu1 %v368_v7  ;;  %629 = vmatpush.msrb.mxu3 %v369_v9 }
  0x60   : > { %637 = vmatpush.msra.mxu0 %v481_v57  ;;  %611 = vmatpush.msrb.mxu2 %v424_v8  ;;  %v722_v57 = vld [vmem:[%s1173_s7] sm:$0xff] }
  0x61   : > { %612 = vmatmul.f32.vlgmr.msrb.gmra.mxu2 %v1097_v50  ;;  %590 = vmatpush.msrb.mxu1 %v364_v11 }
  0x62   : > { %638 = vmatpush.msra.mxu0 %v477_v58  ;;  %630 = vmatpush.msrb.mxu3 %v365_v12 }
  0x63   : > { %591 = vmatpush.msrb.mxu1 %v360_v14 }
  0x64   : > { %639 = vmatpush.msra.mxu0 %v473_v59  ;;  %631 = vmatpush.msrb.mxu3 %v361_v15 }
  0x66   : > { %640 = vmatpush.msra.mxu0 %v469_v60 }
  0x68   : > { %641 = vmatpush.msra.mxu0 %v465_v61  ;;  %v490_v61 = vperm.slane %v486_v25, 2 }
  0x6a   : > { %642 = vmatpush.msra.mxu0 %v461_v62 }
  0x6c   : > { %643 = vmatpush.msra.mxu0 %v457_v2 }
  0x6e   : > { %644 = vmatpush.msra.mxu0 %v453_v6 }
  0x70   : > { %645 = vmatpush.msra.mxu0 %v449_v10 }
  0x72   : > { %646 = vmatpush.msra.mxu0 %v445_v13 }
  0x74   : > { %647 = vmatpush.msra.mxu0 %v441_v16 }
  0x76   : > { %648 = vmatpush.msra.mxu0 %v437_v17 }
  0x78   : > { %649 = vmatpush.msra.mxu0 %v433_v18 }
  0x7a   : > { %650 = vmatpush.msra.mxu0 %v429_v19 }
  0x7c   : > { %651 = vmatpush.msra.mxu0 %v425_v20 }
  0x7d   : > { %652 = vmatmul.f32.vlgmr.msra.gmra.mxu0 %v1097_v50  ;;  %v724_v50 = vld [vmem:[%s1173_s7 + $0x10] sm:$0xff] }
  0xba   : > { %v354_v21 = vpop.f32.mrf.mxu0 }
  0xbb   : > { %512 = vmatmul.f32.vlgmr.msra.gmra.mxu1 %v354_v21  ;;  %552 = vmatmul.f32.vlgmr.msra.gmra.mxu3 %v354_v21 }
  0xbc   : > { %742 = vmatpush.msra.mxu1 %v737_v22 }
  0xbe   : > { %743 = vmatpush.msra.mxu1 %v736_v23  ;;  %v714_v23 = vld [vmem:[#allocation3] sm:$0xff] }
  0xc0   : > { %744 = vmatpush.msra.mxu1 %v735_v24 }
  0xc2   : > { %745 = vmatpush.msra.mxu1 %v734_v26 }
  0xc3   : > { %592 = vmatmul.f32.vlgmr.msrb.gmra.mxu1 %v354_v21  ;;  %632 = vmatmul.f32.vlgmr.msrb.gmra.mxu3 %v354_v21 }
  0xc4   : > { %746 = vmatpush.msra.mxu1 %v733_v28 }
  0xc6   : > { %747 = vmatpush.msra.mxu1 %v732_v29 }
  0xc8   : > { %748 = vmatpush.msra.mxu1 %v731_v33 }
  0xca   : > { %749 = vmatpush.msra.mxu1 %v730_v36 }
  0xcc   : > { %750 = vmatpush.msra.mxu1 %v729_v39 }
  0xce   : > { %751 = vmatpush.msra.mxu1 %v728_v42 }
  0xd0   : > { %752 = vmatpush.msra.mxu1 %v727_v44  ;;  %v763_v44 = vlaneseq }
  0xd2   : > { %753 = vmatpush.msra.mxu1 %v726_v47 }
  0xd4   : > { %754 = vmatpush.msra.mxu1 %v725_v48 }
  0xd6   : > { %755 = vmatpush.msra.mxu1 %v724_v50  ;;  %v783_v50 = vstv %s779_s27 }
  0xd8   : > { %v533_v31 = vpop.f32.mrf.mxu2  ;;  %756 = vmatpush.msra.mxu1 %v723_v55 }
  0xda   : > { %v573_v37 = vpop.f32.mrf.mxu0  ;;  %757 = vmatpush.msra.mxu1 %v722_v57 }
  0xe4   : > { %v613_v3 = vpop.f32.mrf.mxu2 }
  0xfa   : > { %v653_v53 = vpop.f32.mrf.mxu0 }
 0x138   : > { %v513_v30 = vpop.f32.mrf.mxu1 }
 0x139   : > { %v514_v32 = vadd.f32 %v513_v30, %v488_v27 }
 0x13b   : > { %v534_v34 = vadd.f32 %v533_v31, %v514_v32 }
 0x13d   : > { %v854_v38 = vmul.f32 -1.442695, %v534_v34 }
 0x13e   : > { %v553_v40 = vpop.f32.mrf.mxu3 }
 0x13f   : > { %886 = vpow2.f32 %v854_v38  ;;  %v554_v41 = vadd.f32 %v553_v40, %v489_v35 }
 0x140   : > { %v593_v62 = vpop.f32.mrf.mxu1 }
 0x141   : > { %v574_v43 = vadd.f32 %v573_v37, %v554_v41  ;;  %v594_v1 = vadd.f32 %v593_v62, %v490_v61  ;;  %v885_v41 = vld [vmem:[%s1174_s8] ss:$0 sm:$0xff] }
 0x143   : > { %v855_v45 = vmul.f32 -1.442695, %v574_v43  ;;  %v614_v7 = vadd.f32 %v613_v3, %v594_v1 }
 0x145   : > { %v887_v49 = vpop.eup %886  ;;  %888 = vpow2.f32 %v855_v45  ;;  %v764_v45 = vand.u32 127, %v763_v44 }
 0x146   : > { %v659_v51 = vadd.f32 1.0, %v887_v49  ;;  %v633_v52 = vpop.f32.mrf.mxu3  ;;  %v859_v49 = vld [vmem:[%s817_s10 + $0x8] sm:$0xff] }
 0x147   : > { %v634_v54 = vadd.f32 %v633_v52, %v491_v46  ;;  %v765_v46 = vcvt.s32.f32 %v764_v45 }
 0x148   : > { %890 = vrcp.f32 %v659_v51  ;;  %v671_v11 = vand.u32 2147483648, %v659_v51  ;;  %vm665_vm1 = vweird.f32 %v659_v51  ;;  %v669_v13 = vand.u32 2147483647, %v659_v51 }
 0x149   : > { %v654_v56 = vadd.f32 %v653_v53, %v634_v54  ;;  %v784_v53 = vmul.f32 %v859_v49, %v783_v50  ;;  %v962_v54 = vmov 0.0  }
 0x14a   : > { %v672_v18 = vor.u32 1.1754944e-38, %v671_v11  ;;  %vm670_vm5 = vcmp.eq.f32.partialorder %v669_v13, 8.507059e+37 }
 0x14b   : > { %v889_v58 = vpop.eup %888  ;;  %v856_v59 = vmul.f32 -1.442695, %v654_v56 }
 0x14c   : > { %v678_v60 = vadd.f32 1.0, %v889_v58 }
 0x14d   : > { %892 = vpow2.f32 %v856_v59 }
 0x14e   : > { %v891_v63 = vpop.eup %890  ;;  %894 = vrcp.f32 %v678_v60  ;;  %v690_v14 = vand.u32 2147483648, %v678_v60  ;;  %v688_v17 = vand.u32 2147483647, %v678_v60  ;;  %vm684_vm4 = vweird.f32 %v678_v60 }
 0x14f   : > { %v661_v0 = vmul.f32 %v891_v63, %v659_v51  ;;  %vm666_vm0 = vweird.f32 %v891_v63  ;;  %v786_v51 = vstv %s785_s11 }
 0x150   : > { %vm667_vm2 = vmor %vm665_vm1, %vm666_vm0  ;;  %v691_v21 = vor.u32 1.1754944e-38, %v690_v14  ;;  %vm689_vm7 = vcmp.eq.f32.partialorder %v688_v17, 8.507059e+37 }
 0x151   : > { %v662_v2 = vsub.f32 1.0, %v661_v0 }
 0x153   : > { %v893_v4 = vpop.eup %892  ;;  %v663_v5 = vmul.f32 %v891_v63, %v662_v2 }
 0x154   : > { %v895_v6 = vpop.eup %894  ;;  %v698_v8 = vadd.f32 1.0, %v893_v4 }
 0x155   : > { %v680_v9 = vmul.f32 %v895_v6, %v678_v60  ;;  %v664_v10 = vadd.f32 %v891_v63, %v663_v5  ;;  %vm685_vm3 = vweird.f32 %v895_v6 }
 0x156   : > { %896 = vrcp.f32 %v698_v8  ;;  %vm686_vm6 = vmor %vm684_vm4, %vm685_vm3  ;;  %v710_v34 = vand.u32 2147483648, %v698_v8  ;;  %vm704_vm9 = vweird.f32 %v698_v8  ;;  %v708_v35 = vand.u32 2147483647, %v698_v8 }
 0x157   : > { %v681_v12 = vsub.f32 1.0, %v680_v9  ;;  %898 = vtanh.f32 %v614_v7  ;;  %v668_v16 = vsel %vm667_vm2, %v891_v63, %v664_v10 }
 0x158   : > { %v673_v22 = vsel %vm670_vm5, %v672_v18, %v668_v16  ;;  %v711_v37 = vor.u32 1.1754944e-38, %v710_v34  ;;  %vm709_vm11 = vcmp.eq.f32.partialorder %v708_v35, 8.507059e+37 }
 0x159   : > { %v682_v15 = vmul.f32 %v895_v6, %v681_v12 }
 0x15b   : > { %v683_v19 = vadd.f32 %v895_v6, %v682_v15 }
 0x15c   : > { %v897_v20 = vpop.eup %896 }
 0x15d   : > { %v687_v24 = vsel %vm686_vm6, %v895_v6, %v683_v19  ;;  %v700_v25 = vmul.f32 %v897_v20, %v698_v8  ;;  %v899_v26 = vpop.eup %898  ;;  %vm705_vm8 = vweird.f32 %v897_v20 }
 0x15e   : > { %v692_v27 = vsel %vm689_vm7, %v691_v21, %v687_v24  ;;  %v716_v29 = vmul.f32 %v899_v26, %v673_v22  ;;  %vm706_vm10 = vmor %vm704_vm9, %vm705_vm8 }
 0x15f   : > { %v715_v28 = vmul.f32 %v714_v23, %v692_v27  ;;  %v701_v30 = vsub.f32 1.0, %v700_v25 }
 0x161   : > { %v717_v31 = vadd.f32 %v716_v29, %v715_v28  ;;  %v702_v32 = vmul.f32 %v897_v20, %v701_v30 }
 0x163   : > { %900 = vtanh.f32 %v717_v31  ;;  %720 = vst [vmem:[#allocation3] sm:$0xff] %v717_v31  ;;  %v703_v33 = vadd.f32 %v897_v20, %v702_v32 }
 0x165   : > { %v707_v36 = vsel %vm706_vm10, %v897_v20, %v703_v33 }
 0x166   : > { %v712_v39 = vsel %vm709_vm11, %v711_v37, %v707_v36 }
 0x169   : > { %v901_v38 = vpop.eup %900 }
 0x16a   : > { %v719_v40 = vmul.f32 %v901_v38, %v712_v39 }
 0x16c   : > { %721 = vst [vmem:[#allocation2] sm:$0xff] %v719_v40  ;;  %758 = vmatmul.f32.vlgmr.msra.gmra.mxu1 %v719_v40 }
 0x1e9   : > { %v759_v42 = vpop.f32.mrf.mxu1 }
 0x1ea   : > { %v760_v43 = vadd.f32 %v885_v41, %v759_v42 }
 0x1ec   : > { %762 = vst [vmem:[%s1036_s25] sm:$0xff] %v760_v43  ;;  %766 = vmax.xlane.f32.xlu0 %v760_v43 }
 0x25f   : > { %v767_v47 = vpop.xlane.xlu0 %766 }
 0x260   : > { %vm768_vm12 = vcmp.eq.f32.partialorder %v760_v43, %v767_v47 }
 0x261   : > { %v769_v48 = vsel %vm768_vm12, %v765_v46, 128.0 }
 0x262   : > { %770 = vmin.xlane.f32.xlu0 %v769_v48 }
 0x2d5   : > { %v771_v52 = vpop.xlane.xlu0 %770 }
 0x2d6   : > { %vm772_vm13 = vcmp.eq.f32.partialorder %v765_v46, %v771_v52 }
 0x2d7   : > { %v857_v55 = vsel %vm772_vm13, 1.0, %v962_v54 }
 0x2d8   : > { %v787_v56 = vmul.f32 %v857_v55, %v786_v51 }
 0x2da   : > { %v788_v57 = vadd.f32 %v787_v56, %v784_v53 }
 0x2dc   : > { %789 = vst [vmem:[#allocation4] sm:$0xff] %v788_v57 }
 0x2dd PF: > { %s28_s13 = sadd.s32 1, %s956_s13  }
 0x2de   : > { %p25_p9 = scmp.ge.s32.totalorder %s28_s13, 9  }
 0x2e0   :  { %27 = sbr.rel (!%p25_p9) target bundleno = 7 (0x7), region = 89 }
 0x2e5   :  { %809 = vsyncpa [#allocation8], 1 }
 0x2e6   :  { %811 = vsyncpa [#allocation8 + $0x1], 1 }

</bundles_post_ra>
